<compile_context>
chip_gen: v7x
topology: tpu7x:2x2x1
jax: 0.10.0
libtpu: 0.0.40
codegen_flags: <defaults>
</compile_context>

<pallas_src>
import math

import jax
import jax.numpy as jnp
from jax.experimental import pallas as pl
from jax.experimental.pallas import tpu as pltpu

NUMBER_OF_AGENTS = 6
STATE_SIZE = (2 * 2 + 1 + 5 * 2 + 1 + 1
              + (NUMBER_OF_AGENTS - 1) * 1
              + (NUMBER_OF_AGENTS - 1) * 1
              + (NUMBER_OF_AGENTS - 1) * 1)          # = 32
ACTION_SIZE = 4
HIDDEN = (512, 256, 256)
NEG_SLOPE = 0.01          # torch default for F.leaky_relu / nn.LeakyReLU

K_PAD = 128               # first-layer contraction, zero-padded from 32
OUT_PAD = 128             # last-layer output, zero-padded from 4 (lane-dense)
MAX_TILE_B = 1024         # batch-tile cap (VMEM headroom on every generation)


def _leaky_relu(x):
    # max(x, a*x) == leaky_relu(x) for 0 < a < 1; one fewer VALU op than
    # cmp + select + mul.
    return jnp.maximum(x, NEG_SLOPE * x)


def _choose_tile_b(batch):
    """Adaptive batch tile.

    Multiple of 256 (256-row MXU fill on v6e/v7x), capped at MAX_TILE_B, and
    for batches > 256 rows sized so there are >= 2 grid steps (megacore).
    """
    if batch <= 256:
        return 256
    half = (batch + 1) // 2
    tile = ((half + 255) // 256) * 256          # round half up to 256-multiple
    return max(256, min(MAX_TILE_B, tile))


def _resident(shape):
    """VMEM-resident block (constant index_map), single-buffered."""
    try:
        return pl.BlockSpec(shape, lambda i: (0, 0),
                            pipeline_mode=pl.Buffered(1))
    except (TypeError, AttributeError):
        # Older Pallas without pipeline_mode / Buffered: fall back to default
        # double-buffering (only costs ~0.6 MiB of duplicated weights).
        return pl.BlockSpec(shape, lambda i: (0, 0))


def dqn_kernel(x_ref,
               w1_ref, b1_ref,
               w2_ref, b2_ref,
               w3_ref, b3_ref,
               w4_ref, b4_ref,
               o_ref):
    """Fused 4-layer MLP. bf16 MXU inputs, f32 accumulation, f32 epilogue."""
    # Layer 1: (tile_b, 128) @ (128, 512)
    h = jnp.dot(x_ref[...], w1_ref[...],
                preferred_element_type=jnp.float32) + b1_ref[...]
    h = _leaky_relu(h)
    # Layer 2: (tile_b, 512) @ (512, 256)
    h = jnp.dot(h.astype(jnp.bfloat16), w2_ref[...],
                preferred_element_type=jnp.float32) + b2_ref[...]
    h = _leaky_relu(h)
    # Layer 3: (tile_b, 256) @ (256, 256)
    h = jnp.dot(h.astype(jnp.bfloat16), w3_ref[...],
                preferred_element_type=jnp.float32) + b3_ref[...]
    h = _leaky_relu(h)
    # Layer 4 (linear, lane-dense padded output): (tile_b, 256) @ (256, 128)
    h = jnp.dot(h.astype(jnp.bfloat16), w4_ref[...],
                preferred_element_type=jnp.float32) + b4_ref[...]
    o_ref[...] = h.astype(o_ref.dtype)


def dqn_forward(x, params, *, tile_b=None, out_dtype=jnp.float32):
    """x: (B, STATE_SIZE) f32. params: (w1,b1,...,w4,b4) padded (bf16 W, f32 b)."""
    batch = x.shape[0]
    if tile_b is None:
        tile_b = _choose_tile_b(batch)
    num_tiles = pl.cdiv(batch, tile_b)

    # Feature pad 32 -> 128 (aligned MXU contraction) + bf16 cast for the MXU.
    # NOTE: no batch padding -- the last grid tile is ragged and its garbage
    # rows are sliced off below.
    x_pad = jnp.pad(x.astype(jnp.bfloat16),
                    ((0, 0), (0, K_PAD - STATE_SIZE)))

    w1, b1, w2, b2, w3, b3, w4, b4 = params

    out = pl.pallas_call(
        dqn_kernel,
        out_shape=jax.ShapeDtypeStruct((batch, OUT_PAD), out_dtype),
        grid=(num_tiles,),
        in_specs=[
            pl.BlockSpec((tile_b, K_PAD), lambda i: (i, 0)),   # x tile (dbl-buffered)
            _resident(w1.shape), _resident(b1.shape),
            _resident(w2.shape), _resident(b2.shape),
            _resident(w3.shape), _resident(b3.shape),
            _resident(w4.shape), _resident(b4.shape),
        ],
        out_specs=pl.BlockSpec((tile_b, OUT_PAD), lambda i: (i, 0)),
        compiler_params=pltpu.CompilerParams(
            dimension_semantics=("parallel",),
            vmem_limit_bytes=32 * 1024 * 1024),
    )(x_pad, w1, b1, w2, b2, w3, b3, w4, b4)

    return out[:, :ACTION_SIZE]


def init_dqn_params(key):
    """Kaiming-uniform(leaky_relu) weights, zero biases, padded + bf16 weights.

    Weights are pre-transposed to (in_features, out_features).
    w1 is zero-padded K 32->128; w4/b4 are zero-padded N 4->128.
    # TODO(synk): exact PyTorch nn.Linear default-init parity would require
    # kaiming_uniform_(a=sqrt(5)) semantics; load real checkpoint weights for
    # bit-parity with the Torch DQN.
    """
    dims = (STATE_SIZE,) + HIDDEN + (ACTION_SIZE,)
    gain = math.sqrt(2.0 / (1.0 + NEG_SLOPE ** 2))
    params = []
    for li, (fan_in, fan_out) in enumerate(zip(dims[:-1], dims[1:])):
        key, sub = jax.random.split(key)
        bound = gain * math.sqrt(3.0 / fan_in)
        w = jax.random.uniform(sub, (fan_in, fan_out), jnp.float32,
                               minval=-bound, maxval=bound)
        b = jnp.zeros((1, fan_out), jnp.float32)
        if li == 0:                                   # pad K: 32 -> 128
            w = jnp.pad(w, ((0, K_PAD - fan_in), (0, 0)))
        if li == len(dims) - 2:                       # pad N: 4 -> 128
            w = jnp.pad(w, ((0, 0), (0, OUT_PAD - fan_out)))
            b = jnp.pad(b, ((0, 0), (0, OUT_PAD - fan_out)))
        params.append(w.astype(jnp.bfloat16))
        params.append(b)                              # biases stay f32
    return tuple(params)


def dqn_reference(x, params):
    """Pure-JAX reference with identical bf16-in / f32-accumulate semantics."""
    w1, b1, w2, b2, w3, b3, w4, b4 = params
    h = jnp.pad(x.astype(jnp.bfloat16), ((0, 0), (0, K_PAD - STATE_SIZE)))
    h = _leaky_relu(jnp.dot(h, w1, preferred_element_type=jnp.float32) + b1)
    h = _leaky_relu(jnp.dot(h.astype(jnp.bfloat16), w2,
                            preferred_element_type=jnp.float32) + b2)
    h = _leaky_relu(jnp.dot(h.astype(jnp.bfloat16), w3,
                            preferred_element_type=jnp.float32) + b3)
    h = jnp.dot(h.astype(jnp.bfloat16), w4,
                preferred_element_type=jnp.float32) + b4
    return h[:, :ACTION_SIZE]


if __name__ == "__main__":
    key = jax.random.PRNGKey(0)
    k_params, k_x = jax.random.split(key)

    params = init_dqn_params(k_params)

    batch = 8
    x = jax.random.normal(k_x, (batch, STATE_SIZE), jnp.float32)

    out = dqn_forward(x, params)
    out = jax.block_until_ready(out)

    ref = dqn_reference(x, params)
    assert out.shape == (batch, ACTION_SIZE)
    assert jnp.allclose(out, ref, atol=5e-3, rtol=5e-3), "mismatch vs reference"

    # Exercise the multi-tile / ragged-last-tile path once as well.
    batch2 = 600
    x2 = jax.random.normal(jax.random.PRNGKey(1), (batch2, STATE_SIZE),
                           jnp.float32)
    out2 = jax.block_until_ready(dqn_forward(x2, params))
    ref2 = dqn_reference(x2, params)
    assert out2.shape == (batch2, ACTION_SIZE)
    assert jnp.allclose(out2, ref2, atol=5e-3, rtol=5e-3), "mismatch (ragged)"

    print("KERNEL_OK")
</pallas_src>

<mosaic_0001>
module attributes {stable_mosaic.version = 11 : i64} {
  func.func @dqn_kernel(%arg0: i32, %arg1: memref<256x128xbf16, #tpu.memory_space<vmem>>, %arg2: memref<128x512xbf16, #tpu.memory_space<vmem>>, %arg3: memref<1x512xf32, #tpu.memory_space<vmem>>, %arg4: memref<512x256xbf16, #tpu.memory_space<vmem>>, %arg5: memref<1x256xf32, #tpu.memory_space<vmem>>, %arg6: memref<256x256xbf16, #tpu.memory_space<vmem>>, %arg7: memref<1x256xf32, #tpu.memory_space<vmem>>, %arg8: memref<256x128xbf16, #tpu.memory_space<vmem>>, %arg9: memref<1x128xf32, #tpu.memory_space<vmem>>, %arg10: memref<256x128xf32, #tpu.memory_space<vmem>>) attributes {dimension_semantics = [#tpu.dimension_semantics<parallel>], iteration_bounds = array<i64: 1>, scalar_prefetch = 0 : i64, scratch_operands = 0 : i64, tpu.core_type = #tpu.core_type<tc>, window_params = [{transform_indices = @transform_0, window_bounds = array<i64: 256, 128>}, {pipeline_mode = #tpu.pipeline_mode<synchronous>, transform_indices = @transform_1, window_bounds = array<i64: 128, 512>}, {pipeline_mode = #tpu.pipeline_mode<synchronous>, transform_indices = @transform_2, window_bounds = array<i64: 1, 512>}, {pipeline_mode = #tpu.pipeline_mode<synchronous>, transform_indices = @transform_3, window_bounds = array<i64: 512, 256>}, {pipeline_mode = #tpu.pipeline_mode<synchronous>, transform_indices = @transform_4, window_bounds = array<i64: 1, 256>}, {pipeline_mode = #tpu.pipeline_mode<synchronous>, transform_indices = @transform_5, window_bounds = array<i64: 256, 256>}, {pipeline_mode = #tpu.pipeline_mode<synchronous>, transform_indices = @transform_6, window_bounds = array<i64: 1, 256>}, {pipeline_mode = #tpu.pipeline_mode<synchronous>, transform_indices = @transform_7, window_bounds = array<i64: 256, 128>}, {pipeline_mode = #tpu.pipeline_mode<synchronous>, transform_indices = @transform_8, window_bounds = array<i64: 1, 128>}, {transform_indices = @transform_9, window_bounds = array<i64: 256, 128>}]} {
    %c0 = arith.constant 0 : index
    %c0_0 = arith.constant 0 : index
    %0 = vector.load %arg1[%c0, %c0_0] : memref<256x128xbf16, #tpu.memory_space<vmem>>, vector<256x128xbf16>
    %c0_1 = arith.constant 0 : index
    %c0_2 = arith.constant 0 : index
    %1 = vector.load %arg2[%c0_1, %c0_2] : memref<128x512xbf16, #tpu.memory_space<vmem>>, vector<128x512xbf16>
    %cst = arith.constant dense<0.000000e+00> : vector<256x512xf32>
    %2 = tpu.matmul %0, %1, %cst {dimension_numbers = #tpu.dot_dimension_numbers<[1], [0], [0], [1], [0, 0, 1, 1], [], []>} : vector<256x128xbf16>, vector<128x512xbf16>, vector<256x512xf32> -> vector<256x512xf32>
    %c0_3 = arith.constant 0 : index
    %c0_4 = arith.constant 0 : index
    %3 = vector.load %arg3[%c0_3, %c0_4] : memref<1x512xf32, #tpu.memory_space<vmem>>, vector<1x512xf32>
    %4 = vector.broadcast %3 : vector<1x512xf32> to vector<256x512xf32>
    %5 = arith.addf %2, %4 : vector<256x512xf32>
    %cst_5 = arith.constant 0.00999999977 : f32
    %6 = vector.broadcast %cst_5 : f32 to vector<256x512xf32>
    %7 = arith.mulf %6, %5 : vector<256x512xf32>
    %8 = arith.maximumf %5, %7 : vector<256x512xf32>
    %9 = arith.truncf %8 : vector<256x512xf32> to vector<256x512xbf16>
    %c0_6 = arith.constant 0 : index
    %c0_7 = arith.constant 0 : index
    %10 = vector.load %arg4[%c0_6, %c0_7] : memref<512x256xbf16, #tpu.memory_space<vmem>>, vector<512x256xbf16>
    %cst_8 = arith.constant dense<0.000000e+00> : vector<256x256xf32>
    %11 = tpu.matmul %9, %10, %cst_8 {dimension_numbers = #tpu.dot_dimension_numbers<[1], [0], [0], [1], [0, 0, 1, 1], [], []>} : vector<256x512xbf16>, vector<512x256xbf16>, vector<256x256xf32> -> vector<256x256xf32>
    %c0_9 = arith.constant 0 : index
    %c0_10 = arith.constant 0 : index
    %12 = vector.load %arg5[%c0_9, %c0_10] : memref<1x256xf32, #tpu.memory_space<vmem>>, vector<1x256xf32>
    %13 = vector.broadcast %12 : vector<1x256xf32> to vector<256x256xf32>
    %14 = arith.addf %11, %13 : vector<256x256xf32>
    %cst_11 = arith.constant 0.00999999977 : f32
    %15 = vector.broadcast %cst_11 : f32 to vector<256x256xf32>
    %16 = arith.mulf %15, %14 : vector<256x256xf32>
    %17 = arith.maximumf %14, %16 : vector<256x256xf32>
    %18 = arith.truncf %17 : vector<256x256xf32> to vector<256x256xbf16>
    %c0_12 = arith.constant 0 : index
    %c0_13 = arith.constant 0 : index
    %19 = vector.load %arg6[%c0_12, %c0_13] : memref<256x256xbf16, #tpu.memory_space<vmem>>, vector<256x256xbf16>
    %cst_14 = arith.constant dense<0.000000e+00> : vector<256x256xf32>
    %20 = tpu.matmul %18, %19, %cst_14 {dimension_numbers = #tpu.dot_dimension_numbers<[1], [0], [0], [1], [0, 0, 1, 1], [], []>} : vector<256x256xbf16>, vector<256x256xbf16>, vector<256x256xf32> -> vector<256x256xf32>
    %c0_15 = arith.constant 0 : index
    %c0_16 = arith.constant 0 : index
    %21 = vector.load %arg7[%c0_15, %c0_16] : memref<1x256xf32, #tpu.memory_space<vmem>>, vector<1x256xf32>
    %22 = vector.broadcast %21 : vector<1x256xf32> to vector<256x256xf32>
    %23 = arith.addf %20, %22 : vector<256x256xf32>
    %cst_17 = arith.constant 0.00999999977 : f32
    %24 = vector.broadcast %cst_17 : f32 to vector<256x256xf32>
    %25 = arith.mulf %24, %23 : vector<256x256xf32>
    %26 = arith.maximumf %23, %25 : vector<256x256xf32>
    %27 = arith.truncf %26 : vector<256x256xf32> to vector<256x256xbf16>
    %c0_18 = arith.constant 0 : index
    %c0_19 = arith.constant 0 : index
    %28 = vector.load %arg8[%c0_18, %c0_19] : memref<256x128xbf16, #tpu.memory_space<vmem>>, vector<256x128xbf16>
    %cst_20 = arith.constant dense<0.000000e+00> : vector<256x128xf32>
    %29 = tpu.matmul %27, %28, %cst_20 {dimension_numbers = #tpu.dot_dimension_numbers<[1], [0], [0], [1], [0, 0, 1, 1], [], []>} : vector<256x256xbf16>, vector<256x128xbf16>, vector<256x128xf32> -> vector<256x128xf32>
    %c0_21 = arith.constant 0 : index
    %c0_22 = arith.constant 0 : index
    %30 = vector.load %arg9[%c0_21, %c0_22] : memref<1x128xf32, #tpu.memory_space<vmem>>, vector<1x128xf32>
    %31 = vector.broadcast %30 : vector<1x128xf32> to vector<256x128xf32>
    %32 = arith.addf %29, %31 : vector<256x128xf32>
    %c0_23 = arith.constant 0 : index
    %c0_24 = arith.constant 0 : index
    %33 = vector.load %arg10[%c0_23, %c0_24] : memref<256x128xf32, #tpu.memory_space<vmem>>, vector<256x128xf32>
    tpu.vector_store %arg10[%c0_23, %c0_24], %32 {strides = array<i32>} : memref<256x128xf32, #tpu.memory_space<vmem>>, vector<256x128xf32>,
    return
  }
  func.func @transform_0(%arg0: i32) -> (i32, i32) {
    %c0_i32 = arith.constant 0 : i32
    %c0_i32_0 = arith.constant 0 : i32
    return %arg0, %c0_i32 : i32, i32
  }
  func.func @transform_1(%arg0: i32) -> (i32, i32) {
    %c0_i32 = arith.constant 0 : i32
    %c0_i32_0 = arith.constant 0 : i32
    %c0_i32_1 = arith.constant 0 : i32
    return %c0_i32, %c0_i32_0 : i32, i32
  }
  func.func @transform_2(%arg0: i32) -> (i32, i32) {
    %c0_i32 = arith.constant 0 : i32
    %c0_i32_0 = arith.constant 0 : i32
    %c0_i32_1 = arith.constant 0 : i32
    return %c0_i32, %c0_i32_0 : i32, i32
  }
  func.func @transform_3(%arg0: i32) -> (i32, i32) {
    %c0_i32 = arith.constant 0 : i32
    %c0_i32_0 = arith.constant 0 : i32
    %c0_i32_1 = arith.constant 0 : i32
    return %c0_i32, %c0_i32_0 : i32, i32
  }
  func.func @transform_4(%arg0: i32) -> (i32, i32) {
    %c0_i32 = arith.constant 0 : i32
    %c0_i32_0 = arith.constant 0 : i32
    %c0_i32_1 = arith.constant 0 : i32
    return %c0_i32, %c0_i32_0 : i32, i32
  }
  func.func @transform_5(%arg0: i32) -> (i32, i32) {
    %c0_i32 = arith.constant 0 : i32
    %c0_i32_0 = arith.constant 0 : i32
    %c0_i32_1 = arith.constant 0 : i32
    return %c0_i32, %c0_i32_0 : i32, i32
  }
  func.func @transform_6(%arg0: i32) -> (i32, i32) {
    %c0_i32 = arith.constant 0 : i32
    %c0_i32_0 = arith.constant 0 : i32
    %c0_i32_1 = arith.constant 0 : i32
    return %c0_i32, %c0_i32_0 : i32, i32
  }
  func.func @transform_7(%arg0: i32) -> (i32, i32) {
    %c0_i32 = arith.constant 0 : i32
    %c0_i32_0 = arith.constant 0 : i32
    %c0_i32_1 = arith.constant 0 : i32
    return %c0_i32, %c0_i32_0 : i32, i32
  }
  func.func @transform_8(%arg0: i32) -> (i32, i32) {
    %c0_i32 = arith.constant 0 : i32
    %c0_i32_0 = arith.constant 0 : i32
    %c0_i32_1 = arith.constant 0 : i32
    return %c0_i32, %c0_i32_0 : i32, i32
  }
  func.func @transform_9(%arg0: i32) -> (i32, i32) {
    %c0_i32 = arith.constant 0 : i32
    %c0_i32_0 = arith.constant 0 : i32
    return %arg0, %c0_i32 : i32, i32
  }
}

</mosaic_0001>

<bundles_post_ra>
// kernel: tpu_custom_call.1
= control target key start
LH: loop header
LB: loop body
LE: loop exit
PB: predicated region body
PF: predicated region fallthrough
CT: control target
= control target key end

     0   :  { %14 = vsyncpa [#allocation3], 0  ;;  %s4386_s0 = inlined_call_operand.hbm [shape: bf16[8,128], index: 0, kind: input, shape index: {}]   ;;  %s4387_s1 = inlined_call_operand.hbm [shape: bf16[128,512], index: 1, kind: input, shape index: {}]   ;;  %s4388_s2 = inlined_call_operand.vmem [shape: f32[1,512], index: 2, kind: input, shape index: {}]   ;;  %s4389_s3 = inlined_call_operand.hbm [shape: bf16[512,256], index: 3, kind: input, shape index: {}]   ;;  %s4390_s4 = inlined_call_operand.vmem [shape: f32[1,256], index: 4, kind: input, shape index: {}]   ;;  %s4391_s5 = inlined_call_operand.hbm [shape: bf16[256,256], index: 5, kind: input, shape index: {}]   ;;  %s4392_s6 = inlined_call_operand.vmem [shape: f32[1,256], index: 6, kind: input, shape index: {}]   ;;  %s4393_s7 = inlined_call_operand.hbm [shape: bf16[256,128], index: 7, kind: input, shape index: {}]   ;;  %s4394_s8 = inlined_call_operand.vmem [shape: f32[1,128], index: 8, kind: input, shape index: {}]   ;;  %s4395_s9 = inlined_call_operand.hbm [shape: f32[8,128], index: 9, kind: output, shape index: {}]  }
   0x1   :  { %15 = vsyncpa [#allocation6], 0 }
   0x2   :  { %16 = vsyncpa [#allocation9], 0 }
   0x3   :  { %17 = vsyncpa [#allocation4], 0 }
   0x4   :  { %22 = vsyncadd [#allocation3], 1984  ;;  %s3774_s30 = smov [#allocation5]   ;;  %s3634_s13 = scalar_lea.hbm %s4387_s1, 4096 }
   0x5   :  { %s35_s10 = sshll.u32 %s3774_s30, 4  ;;  %p3635_p0 = scmp.ne.s32.totalorder %s4387_s1, %s3634_s13  ;;  %s36_s10 = int_to_ptr.vmem [resolvable:$true] %s35_s10 }
   0x6   :  { %p3638_p1 = scmp.lt.u32.totalorder %s3634_s13, %s4387_s1 }
   0x8   :  { %p3640_p2 = pnand %p3638_p1, %p3635_p0 }
   0xa   :  { %3643 = shalt.err (!%p3640_p2)
}
   0xb   :  { %s3644_s18 = scalar_lea.vmem %s36_s10, 4096  ;;  %p3649_p4 = scmp.lt.s32.totalorder %s36_s10, %s36_s10 }
   0xc   :  { %p3645_p3 = scmp.ne.s32.totalorder %s36_s10, %s3644_s18  ;;  %p3650_p5 = scmp.lt.s32.totalorder %s3644_s18, %s3644_s18 }
   0xe   :  { %p3651_p6 = por %p3650_p5, %p3649_p4 }
  0x10   :  { %p3652_p7 = pnand %p3651_p6, %p3645_p3 }
  0x12   :  { %3655 = shalt.err (!%p3652_p7)
}
  0x13   :  { %s3775_s19 = smov 256   ;;  %s3776_s20 = smov 16  }
  0x14   :  { %41 = dma.hbm_to_vmem [thread:$0]  %s4387_s1, 4096, %s36_s10, [#allocation6], %s3775_s19, %s3775_s19, %s3776_s20  }
  0x15   :  { %s3777_s23 = smov [#allocation8]   ;;  %s3778_s25 = smov [#allocation2]  }
  0x16   :  { %s63_s24 = sshll.u32 %s3777_s23, 4  ;;  %s23_s26 = sshll.u32 %s3778_s25, 4  ;;  %s64_s24 = int_to_ptr.vmem [resolvable:$true] %s63_s24  ;;  %s24_s26 = int_to_ptr.vmem [resolvable:$true] %s23_s26 }
  0x17   :  { %s3656_s29 = scalar_lea.hbm %s4391_s5, 4096 }
  0x18   :  { %p3657_p8 = scmp.ne.s32.totalorder %s4391_s5, %s3656_s29  ;;  %p3660_p9 = scmp.lt.u32.totalorder %s3656_s29, %s4391_s5 }
  0x1a   :  { %p3662_p10 = pnand %p3660_p9, %p3657_p8 }
  0x1c   :  { %3665 = shalt.err (!%p3662_p10)
}
  0x1d   :  { %s3666_s1 = scalar_lea.vmem %s64_s24, 4096  ;;  %p3671_p12 = scmp.lt.s32.totalorder %s64_s24, %s64_s24 }
  0x1e   :  { %p3667_p11 = scmp.ne.s32.totalorder %s64_s24, %s3666_s1  ;;  %p3672_p13 = scmp.lt.s32.totalorder %s3666_s1, %s3666_s1 }
  0x20   :  { %p3673_p0 = por %p3672_p13, %p3671_p12 }
  0x22   :  { %p3674_p1 = pnand %p3673_p0, %p3667_p11 }
  0x24   :  { %3677 = shalt.err (!%p3674_p1)
}
  0x25   :  { %s3779_s10 = smov 128   ;;  %s3780_s14 = smov 8  }
  0x26   :  { %69 = dma.hbm_to_vmem [thread:$0]  %s4391_s5, 4096, %s64_s24, [#allocation9], %s3779_s10, %s3779_s10, %s3780_s14  }
  0x27   :  { %s3678_s19 = scalar_lea.hbm %s4386_s0, 64 }
  0x28   :  { %p3679_p2 = scmp.ne.s32.totalorder %s4386_s0, %s3678_s19  ;;  %p3682_p3 = scmp.lt.u32.totalorder %s3678_s19, %s4386_s0 }
  0x2a   :  { %p3684_p4 = pnand %p3682_p3, %p3679_p2 }
  0x2c   :  { %3687 = shalt.err (!%p3684_p4)
}
  0x2d   :  { %s3688_s25 = scalar_lea.vmem %s24_s26, 64  ;;  %s3692_s27 = scalar_lea.vmem %s24_s26, 2048 }
  0x2e   :  { %p3689_p5 = scmp.ne.s32.totalorder %s24_s26, %s3688_s25  ;;  %p3693_p6 = scmp.lt.s32.totalorder %s24_s26, %s24_s26 }
  0x2f   :  { %p3694_p7 = scmp.lt.s32.totalorder %s3692_s27, %s3688_s25 }
  0x31   :  { %p3695_p8 = por %p3694_p7, %p3693_p6 }
  0x33   :  { %p3696_p9 = pnand %p3695_p8, %p3689_p5 }
  0x35   :  { %3699 = shalt.err (!%p3696_p9)
}
  0x36   :  { %s3781_s5 = smov 64   ;;  %s3782_s24 = smov 4  }
  0x37   :  { %29 = dma.hbm_to_vmem [thread:$0]  %s4386_s0, 64, %s24_s26, [#allocation3], %s3781_s5, %s3781_s5, %s3782_s24  }
  0x38   :  { %s3783_s30 = smov [#allocation7]   ;;  %s3784_s12 = smov [#allocation10]  }
  0x39   :  { %s49_s11 = sshll.u32 %s3783_s30, 4  ;;  %s77_s13 = sshll.u32 %s3784_s12, 4  ;;  %s50_s11 = int_to_ptr.vmem [resolvable:$true] %s49_s11  ;;  %s78_s13 = int_to_ptr.vmem [resolvable:$true] %s77_s13 }
  0x3a   :  { %s3700_s16 = scalar_lea.hbm %s4389_s3, 8192 }
  0x3b   :  { %p3701_p10 = scmp.ne.s32.totalorder %s4389_s3, %s3700_s16  ;;  %p3704_p11 = scmp.lt.u32.totalorder %s3700_s16, %s4389_s3 }
  0x3d   :  { %p3706_p12 = pnand %p3704_p11, %p3701_p10 }
  0x3f   :  { %3709 = shalt.err (!%p3706_p12)
}
  0x40   :  { %s3710_s0 = scalar_lea.vmem %s50_s11, 8192  ;;  %p3715_p0 = scmp.lt.s32.totalorder %s50_s11, %s50_s11 }
  0x41   :  { %p3711_p13 = scmp.ne.s32.totalorder %s50_s11, %s3710_s0  ;;  %p3716_p1 = scmp.lt.s32.totalorder %s3710_s0, %s3710_s0 }
  0x43   :  { %p3717_p2 = por %p3716_p1, %p3715_p0 }
  0x45   :  { %p3718_p3 = pnand %p3717_p2, %p3711_p13 }
  0x47   :  { %3721 = shalt.err (!%p3718_p3)
}
  0x48   :  { %55 = dma.hbm_to_vmem [thread:$0]  %s4389_s3, 8192, %s50_s11, [#allocation6], %s3779_s10, %s3779_s10, %s3780_s14  }
  0x49   :  { %s3722_s25 = scalar_lea.hbm %s4393_s7, 2048 }
  0x4a   :  { %p3723_p4 = scmp.ne.s32.totalorder %s4393_s7, %s3722_s25  ;;  %p3726_p5 = scmp.lt.u32.totalorder %s3722_s25, %s4393_s7 }
  0x4c   :  { %p3728_p6 = pnand %p3726_p5, %p3723_p4 }
  0x4e   :  { %3731 = shalt.err (!%p3728_p6)
}
  0x4f   :  { %s3732_s12 = scalar_lea.vmem %s78_s13, 2048  ;;  %p3737_p8 = scmp.lt.s32.totalorder %s78_s13, %s78_s13 }
  0x50   :  { %p3733_p7 = scmp.ne.s32.totalorder %s78_s13, %s3732_s12  ;;  %p3738_p9 = scmp.lt.s32.totalorder %s3732_s12, %s3732_s12 }
  0x52   :  { %p3739_p10 = por %p3738_p9, %p3737_p8 }
  0x54   :  { %p3740_p11 = pnand %p3739_p10, %p3733_p7 }
  0x56   :  { %3743 = shalt.err (!%p3740_p11)
}
  0x57   :  { %83 = dma.hbm_to_vmem [thread:$0]  %s4393_s7, 2048, %s78_s13, [#allocation9], %s3781_s5, %s3781_s5, %s3782_s24  }
  0x58   :  { %3766 = dma.done.wait [#allocation3], 2048  }
  0x59   :  { %3767 = vsyncadd [#allocation3], 4294965248 }
  0x5a   :  { %3768 = dma.done.wait [#allocation6], 12288  }
  0x5b   :  { %3769 = vsyncadd [#allocation6], 4294955008 }
  0x5c   :  { %3770 = dma.done.wait [#allocation9], 6144  }
  0x5d   :  { %3771 = vsyncadd [#allocation9], 4294961152  ;;  %v3785_v0 = vmov 0   ;;  %v3410_v1 = vld [vmem:[#allocation5 + $0x4] ss:$16 sps:$4 sm:$0xff]   ;;  %v3435_v32 = vld [vmem:[#allocation2 + $0x8] sm:$0xff]  }
  0x5e   :  { %476 = vmatprep.mubr.bf16.mxu0 %v3785_v0  ;;  %669 = vmatprep.mubr.bf16.mxu1 %v3785_v0  ;;  %v3412_v2 = vld [vmem:[#allocation5] ss:$16 sps:$4 sm:$0xff]   ;;  %v3413_v3 = vld [vmem:[#allocation5 + $0x24] ss:$16 sps:$4 sm:$0xff]   ;;  %v3446_v16 = vld [vmem:[#allocation5 + $0xc] ss:$16 sps:$4 sm:$0xff]  }
  0x5f   :  { %444 = vmatprep.subr.bf16.mxu0 %v3410_v1  ;;  %v3415_v4 = vld [vmem:[#allocation5 + $0x20] ss:$16 sps:$4 sm:$0xff]   ;;  %v3416_v5 = vld [vmem:[#allocation5 + $0x44] ss:$16 sps:$4 sm:$0xff]   ;;  %v3448_v17 = vld [vmem:[#allocation5 + $0x8] ss:$16 sps:$4 sm:$0xff]   ;;  %637 = vmatprep.subr.bf16.mxu1 %v3446_v16 }
  0x60   :  { %445 = vmatpush1.bf16.msra.mxu0 %v3412_v2  ;;  %v3418_v6 = vld [vmem:[#allocation5 + $0x40] ss:$16 sps:$4 sm:$0xff]   ;;  %v3419_v7 = vld [vmem:[#allocation5 + $0x64] ss:$16 sps:$4 sm:$0xff]   ;;  %v3449_v18 = vld [vmem:[#allocation5 + $0x2c] ss:$16 sps:$4 sm:$0xff]   ;;  %638 = vmatpush1.bf16.msra.mxu1 %v3448_v17 }
  0x61   :  { %446 = vmatprep.subr.bf16.mxu0 %v3413_v3  ;;  %v3421_v8 = vld [vmem:[#allocation5 + $0x60] ss:$16 sps:$4 sm:$0xff]   ;;  %v3422_v9 = vld [vmem:[#allocation5 + $0x84] ss:$16 sps:$4 sm:$0xff]   ;;  %639 = vmatprep.subr.bf16.mxu1 %v3449_v18  ;;  %v3455_v20 = vld [vmem:[#allocation5 + $0x28] ss:$16 sps:$4 sm:$0xff]  }
  0x62   :  { %v3424_v10 = vld [vmem:[#allocation5 + $0x80] ss:$16 sps:$4 sm:$0xff]   ;;  %v3425_v11 = vld [vmem:[#allocation5 + $0xa4] ss:$16 sps:$4 sm:$0xff]   ;;  %v3456_v22 = vld [vmem:[#allocation5 + $0x4c] ss:$16 sps:$4 sm:$0xff]  }
  0x63   :  { %v3427_v12 = vld [vmem:[#allocation5 + $0xa0] ss:$16 sps:$4 sm:$0xff]   ;;  %v3428_v13 = vld [vmem:[#allocation5 + $0xc4] ss:$16 sps:$4 sm:$0xff]   ;;  %v3458_v24 = vld [vmem:[#allocation5 + $0x48] ss:$16 sps:$4 sm:$0xff]  }
  0x64   :  { %447 = vmatpush1.bf16.msra.mxu0 %v3415_v4  ;;  %v3430_v14 = vld [vmem:[#allocation5 + $0xc0] ss:$16 sps:$4 sm:$0xff]   ;;  %v3431_v15 = vld [vmem:[#allocation5 + $0xe4] ss:$16 sps:$4 sm:$0xff]   ;;  %640 = vmatpush1.bf16.msra.mxu1 %v3455_v20  ;;  %v3459_v26 = vld [vmem:[#allocation5 + $0x6c] ss:$16 sps:$4 sm:$0xff]  }
  0x65   :  { %448 = vmatprep.subr.bf16.mxu0 %v3416_v5  ;;  %v3433_v19 = vld [vmem:[#allocation5 + $0xe0] ss:$16 sps:$4 sm:$0xff]   ;;  %v3453_v21 = vld [vmem:[#allocation7 + $0x4] ss:$8 sps:$4 sm:$0xff]   ;;  %641 = vmatprep.subr.bf16.mxu1 %v3456_v22  ;;  %v3463_v27 = vld [vmem:[#allocation7 + $0x14] ss:$8 sps:$4 sm:$0xff]  }
  0x66   :  { %v3434_v23 = vld [vmem:[#allocation2] sm:$0xff]   ;;  %v3461_v28 = vld [vmem:[#allocation7 + $0x10] ss:$8 sps:$4 sm:$0xff]   ;;  %v3466_v30 = vld [vmem:[#allocation5 + $0x8c] ss:$16 sps:$4 sm:$0xff]  }
  0x67   :  { %v3451_v25 = vld [vmem:[#allocation7] ss:$8 sps:$4 sm:$0xff]   ;;  %v3473_v31 = vld [vmem:[#allocation7 + $0x24] ss:$8 sps:$4 sm:$0xff]   ;;  %v3483_v36 = vld [vmem:[#allocation7 + $0x34] ss:$8 sps:$4 sm:$0xff]  }
  0x68   :  { %449 = vmatpush1.bf16.msra.mxu0 %v3418_v6  ;;  %642 = vmatpush1.bf16.msra.mxu1 %v3458_v24  ;;  %v3465_v29 = vld [vmem:[#allocation5 + $0x68] ss:$16 sps:$4 sm:$0xff]   ;;  %v3469_v34 = vld [vmem:[#allocation5 + $0xac] ss:$16 sps:$4 sm:$0xff]   ;;  %v3436_v41 = vld [vmem:[#allocation2 + $0x10] sm:$0xff]  }
  0x69   :  { %450 = vmatprep.subr.bf16.mxu0 %v3419_v7  ;;  %643 = vmatprep.subr.bf16.mxu1 %v3459_v26  ;;  %v3468_v33 = vld [vmem:[#allocation5 + $0x88] ss:$16 sps:$4 sm:$0xff]   ;;  %v3476_v38 = vld [vmem:[#allocation5 + $0xcc] ss:$16 sps:$4 sm:$0xff]   ;;  %v3438_v54 = vld [vmem:[#allocation2 + $0x20] sm:$0xff]  }
  0x6a   :  { %v3471_v35 = vld [vmem:[#allocation7 + $0x20] ss:$8 sps:$4 sm:$0xff]   ;;  %v3481_v39 = vld [vmem:[#allocation7 + $0x30] ss:$8 sps:$4 sm:$0xff]   ;;  %v3488_v40 = vld [vmem:[#allocation7 + $0x44] ss:$8 sps:$4 sm:$0xff]  }
  0x6b   :  { %v3475_v37 = vld [vmem:[#allocation5 + $0xa8] ss:$16 sps:$4 sm:$0xff]   ;;  %v3479_v43 = vld [vmem:[#allocation5 + $0xec] ss:$16 sps:$4 sm:$0xff]   ;;  %v3440_v1 = vld [vmem:[#allocation2 + $0x30] sm:$0xff]  }
  0x6c   :  { %451 = vmatpush1.bf16.msra.mxu0 %v3421_v8  ;;  %644 = vmatpush1.bf16.msra.mxu1 %v3465_v29  ;;  %v3478_v42 = vld [vmem:[#allocation5 + $0xc8] ss:$16 sps:$4 sm:$0xff]   ;;  %v3491_v45 = vld [vmem:[#allocation7 + $0x54] ss:$8 sps:$4 sm:$0xff]   ;;  %v3494_v48 = vld [vmem:[#allocation7 + $0x64] ss:$8 sps:$4 sm:$0xff]  }
  0x6d   :  { %452 = vmatprep.subr.bf16.mxu0 %v3422_v9  ;;  %645 = vmatprep.subr.bf16.mxu1 %v3466_v30  ;;  %v3486_v44 = vld [vmem:[#allocation7 + $0x40] ss:$8 sps:$4 sm:$0xff]   ;;  %v3489_v47 = vld [vmem:[#allocation7 + $0x50] ss:$8 sps:$4 sm:$0xff]   ;;  %v3497_v51 = vld [vmem:[#allocation7 + $0x74] ss:$8 sps:$4 sm:$0xff]  }
  0x6e   :  { %v3485_v46 = vld [vmem:[#allocation5 + $0xe8] ss:$16 sps:$4 sm:$0xff]   ;;  %v3500_v53 = vld [vmem:[#allocation7 + $0x84] ss:$8 sps:$4 sm:$0xff]   ;;  %v3503_v56 = vld [vmem:[#allocation7 + $0x94] ss:$8 sps:$4 sm:$0xff]  }
  0x6f   :  { %v3437_v49 = vld [vmem:[#allocation2 + $0x18] sm:$0xff]   ;;  %v3492_v50 = vld [vmem:[#allocation7 + $0x60] ss:$8 sps:$4 sm:$0xff]   ;;  %v3506_v58 = vld [vmem:[#allocation7 + $0xa4] ss:$8 sps:$4 sm:$0xff]  }
  0x70   :  { %453 = vmatpush1.bf16.msra.mxu0 %v3424_v10  ;;  %646 = vmatpush1.bf16.msra.mxu1 %v3468_v33  ;;  %v3495_v52 = vld [vmem:[#allocation7 + $0x70] ss:$8 sps:$4 sm:$0xff]   ;;  %v3498_v55 = vld [vmem:[#allocation7 + $0x80] ss:$8 sps:$4 sm:$0xff]   ;;  %v3509_v61 = vld [vmem:[#allocation7 + $0xb4] ss:$8 sps:$4 sm:$0xff]  }
  0x71   :  { %454 = vmatprep.subr.bf16.mxu0 %v3425_v11  ;;  %647 = vmatprep.subr.bf16.mxu1 %v3469_v34  ;;  %v3501_v57 = vld [vmem:[#allocation7 + $0x90] ss:$8 sps:$4 sm:$0xff]   ;;  %v3439_v59 = vld [vmem:[#allocation2 + $0x28] sm:$0xff]   ;;  %v3515_v3 = vld [vmem:[#allocation7 + $0xd4] ss:$8 sps:$4 sm:$0xff]  }
  0x72   :  { %v3504_v60 = vld [vmem:[#allocation7 + $0xa0] ss:$8 sps:$4 sm:$0xff]   ;;  %v3507_v62 = vld [vmem:[#allocation7 + $0xb0] ss:$8 sps:$4 sm:$0xff]   ;;  %v3512_v63 = vld [vmem:[#allocation7 + $0xc4] ss:$8 sps:$4 sm:$0xff]  }
  0x73   :  { %v3510_v2 = vld [vmem:[#allocation7 + $0xc0] ss:$8 sps:$4 sm:$0xff]   ;;  %v3513_v4 = vld [vmem:[#allocation7 + $0xd0] ss:$8 sps:$4 sm:$0xff]   ;;  %v3518_v5 = vld [vmem:[#allocation7 + $0xe4] ss:$8 sps:$4 sm:$0xff]  }
  0x74   :  { %455 = vmatpush1.bf16.msra.mxu0 %v3427_v12  ;;  %648 = vmatpush1.bf16.msra.mxu1 %v3475_v37  ;;  %v3441_v6 = vld [vmem:[#allocation2 + $0x38] sm:$0xff]   ;;  %v3516_v7 = vld [vmem:[#allocation7 + $0xe0] ss:$8 sps:$4 sm:$0xff]   ;;  %v3444_v10 = vld [vmem:[#allocation2 + $0x50] sm:$0xff]  }
  0x75   :  { %456 = vmatprep.subr.bf16.mxu0 %v3428_v13  ;;  %649 = vmatprep.subr.bf16.mxu1 %v3476_v38  ;;  %v3442_v8 = vld [vmem:[#allocation2 + $0x40] sm:$0xff]   ;;  %v3443_v9 = vld [vmem:[#allocation2 + $0x48] sm:$0xff]   ;;  %v3445_v11 = vld [vmem:[#allocation2 + $0x58] sm:$0xff]  }
  0x76   :  { %v3521_v12 = vld [vmem:[#allocation7 + $0xf4] ss:$8 sps:$4 sm:$0xff]   ;;  %v3519_v13 = vld [vmem:[#allocation7 + $0xf0] ss:$8 sps:$4 sm:$0xff]   ;;  %v3464_v16 = vld [vmem:[#allocation2 + $0x68] sm:$0xff]  }
  0x77   :  { %v3474_v17 = vld [vmem:[#allocation2 + $0x70] sm:$0xff]   ;;  %v3484_v18 = vld [vmem:[#allocation2 + $0x78] sm:$0xff]   ;;  %v3949_v22 = vld [vmem:[%s4388_s2] sm:$0xf] }
  0x78   :  { %457 = vmatpush1.bf16.msra.mxu0 %v3430_v14  ;;  %650 = vmatpush1.bf16.msra.mxu1 %v3478_v42  ;;  %v3454_v14 = vld [vmem:[#allocation2 + $0x60] sm:$0xff]  }
  0x79   :  { %458 = vmatprep.subr.bf16.mxu0 %v3431_v15  ;;  %651 = vmatprep.subr.bf16.mxu1 %v3479_v43  ;;  %v3524_v15 = vld [vmem:[#allocation7 + $0x104] ss:$8 sps:$4 sm:$0xff]  }
  0x7c   :  { %459 = vmatpush1.bf16.msra.mxu0 %v3433_v19  ;;  %652 = vmatpush1.bf16.msra.mxu1 %v3485_v46  ;;  %v168_v19 = vlaneseq }
  0x7d   :  { %1546 = vmatprep.subr.bf16.mxu0 %v3453_v21 }
  0x7e   :  { %v3941_v20 = vshrl.u32 %v168_v19, 7 }
  0x7f   :  { %477 = vmatmul.mubr.bf16.vlgmr.msra.gmra.mrb[0].mxu0 %v3434_v23  ;;  %670 = vmatmul.mubr.bf16.vlgmr.msra.gmra.mrb[0].mxu1 %v3434_v23 }
  0x80   :  { %486 = vmatprep.mubr.bf16.mxu0 %v3785_v0  ;;  %1547 = vmatpush1.bf16.msra.mxu0 %v3451_v25  ;;  %v3944_v21 = vsub.s32 0, %v3941_v20  ;;  %v3952_v23 = vsub.s32 1, %v3941_v20 }
  0x81   :  { %1548 = vmatprep.subr.bf16.mxu0 %v3463_v27  ;;  %679 = vmatprep.mubr.bf16.mxu1 %v3785_v0 }
  0x82   :  { %v3956_v24 = vrot.slane %v3949_v22, %v3944_v21 }
  0x84   :  { %1549 = vmatpush1.bf16.msra.mxu0 %v3461_v28 }
  0x85   :  { %1550 = vmatprep.subr.bf16.mxu0 %v3473_v31 }
  0x87   :  { %487 = vmatmul.mubr.bf16.gmra.mrb[4].mxu0 %v3435_v32  ;;  %680 = vmatmul.mubr.bf16.gmra.mrb[4].mxu1 %v3435_v32 }
  0x88   :  { %496 = vmatprep.mubr.bf16.mxu0 %v3785_v0  ;;  %1551 = vmatpush1.bf16.msra.mxu0 %v3471_v35 }
  0x89   :  { %1552 = vmatprep.subr.bf16.mxu0 %v3483_v36  ;;  %689 = vmatprep.mubr.bf16.mxu1 %v3785_v0 }
  0x8c   :  { %1553 = vmatpush1.bf16.msra.mxu0 %v3481_v39 }
  0x8d   :  { %1554 = vmatprep.subr.bf16.mxu0 %v3488_v40 }
  0x8f   :  { %497 = vmatmul.mubr.bf16.gmra.mrb[8].mxu0 %v3436_v41  ;;  %690 = vmatmul.mubr.bf16.gmra.mrb[8].mxu1 %v3436_v41 }
  0x90   :  { %506 = vmatprep.mubr.bf16.mxu0 %v3785_v0  ;;  %1555 = vmatpush1.bf16.msra.mxu0 %v3486_v44 }
  0x91   :  { %1556 = vmatprep.subr.bf16.mxu0 %v3491_v45  ;;  %699 = vmatprep.mubr.bf16.mxu1 %v3785_v0 }
  0x94   :  { %1557 = vmatpush1.bf16.msra.mxu0 %v3489_v47 }
  0x95   :  { %1558 = vmatprep.subr.bf16.mxu0 %v3494_v48  ;;  %v3522_v48 = vld [vmem:[#allocation7 + $0x100] ss:$8 sps:$4 sm:$0xff]  }
  0x97   :  { %507 = vmatmul.mubr.bf16.gmra.mrb[12].mxu0 %v3437_v49  ;;  %700 = vmatmul.mubr.bf16.gmra.mrb[12].mxu1 %v3437_v49 }
  0x98   :  { %516 = vmatprep.mubr.bf16.mxu0 %v3785_v0  ;;  %1559 = vmatpush1.bf16.msra.mxu0 %v3492_v50 }
  0x99   :  { %1560 = vmatprep.subr.bf16.mxu0 %v3497_v51  ;;  %709 = vmatprep.mubr.bf16.mxu1 %v3785_v0 }
  0x9c   :  { %1561 = vmatpush1.bf16.msra.mxu0 %v3495_v52  ;;  %v3527_v52 = vld [vmem:[#allocation7 + $0x114] ss:$8 sps:$4 sm:$0xff]  }
  0x9d   :  { %1562 = vmatprep.subr.bf16.mxu0 %v3500_v53 }
  0x9f   :  { %517 = vmatmul.mubr.bf16.gmra.mrb[16].mxu0 %v3438_v54  ;;  %710 = vmatmul.mubr.bf16.gmra.mrb[16].mxu1 %v3438_v54 }
  0xa0   :  { %526 = vmatprep.mubr.bf16.mxu0 %v3785_v0  ;;  %1563 = vmatpush1.bf16.msra.mxu0 %v3498_v55 }
  0xa1   :  { %1564 = vmatprep.subr.bf16.mxu0 %v3503_v56  ;;  %719 = vmatprep.mubr.bf16.mxu1 %v3785_v0 }
  0xa4   :  { %1565 = vmatpush1.bf16.msra.mxu0 %v3501_v57  ;;  %v3525_v57 = vld [vmem:[#allocation7 + $0x110] ss:$8 sps:$4 sm:$0xff]  }
  0xa5   :  { %1566 = vmatprep.subr.bf16.mxu0 %v3506_v58 }
  0xa7   :  { %527 = vmatmul.mubr.bf16.gmra.mrb[20].mxu0 %v3439_v59  ;;  %720 = vmatmul.mubr.bf16.gmra.mrb[20].mxu1 %v3439_v59 }
  0xa8   :  { %536 = vmatprep.mubr.bf16.mxu0 %v3785_v0  ;;  %1567 = vmatpush1.bf16.msra.mxu0 %v3504_v60  ;;  %v3530_v60 = vld [vmem:[#allocation7 + $0x124] ss:$8 sps:$4 sm:$0xff]  }
  0xa9   :  { %1568 = vmatprep.subr.bf16.mxu0 %v3509_v61  ;;  %729 = vmatprep.mubr.bf16.mxu1 %v3785_v0 }
  0xac   :  { %1569 = vmatpush1.bf16.msra.mxu0 %v3507_v62 }
  0xad   :  { %1570 = vmatprep.subr.bf16.mxu0 %v3512_v63 }
  0xaf   :  { %537 = vmatmul.mubr.bf16.gmra.mrb[24].mxu0 %v3440_v1  ;;  %730 = vmatmul.mubr.bf16.gmra.mrb[24].mxu1 %v3440_v1  ;;  %v178_v1 = vsub.s32 2, %v3941_v20 }
  0xb0   :  { %546 = vmatprep.mubr.bf16.mxu0 %v3785_v0  ;;  %1571 = vmatpush1.bf16.msra.mxu0 %v3510_v2 }
  0xb1   :  { %1572 = vmatprep.subr.bf16.mxu0 %v3515_v3  ;;  %739 = vmatprep.mubr.bf16.mxu1 %v3785_v0 }
  0xb4   :  { %1573 = vmatpush1.bf16.msra.mxu0 %v3513_v4 }
  0xb5   :  { %1574 = vmatprep.subr.bf16.mxu0 %v3518_v5  ;;  %v182_v5 = vsub.s32 3, %v3941_v20  ;;  %v3531_v20 = vld [vmem:[#allocation7 + $0x130] ss:$8 sps:$4 sm:$0xff]  }
  0xb7   :  { %547 = vmatmul.mubr.bf16.gmra.mrb[28].mxu0 %v3441_v6  ;;  %740 = vmatmul.mubr.bf16.gmra.mrb[28].mxu1 %v3441_v6 }
  0xb8   :  { %556 = vmatprep.mubr.bf16.mxu0 %v3785_v0  ;;  %1575 = vmatpush1.bf16.msra.mxu0 %v3516_v7 }
  0xb9   :  { %749 = vmatprep.mubr.bf16.mxu1 %v3785_v0  ;;  %1576 = vmatprep.subr.bf16.mxu0 %v3521_v12 }
  0xbc   :  { %1577 = vmatpush1.bf16.msra.mxu0 %v3519_v13  ;;  %v3533_v13 = vld [vmem:[#allocation7 + $0x134] ss:$8 sps:$4 sm:$0xff]  }
  0xbd   :  { %1739 = vmatprep.subr.bf16.mxu0 %v3524_v15 }
  0xbf   :  { %557 = vmatmul.mubr.bf16.gmra.mrb[32].mxu0 %v3442_v8  ;;  %750 = vmatmul.mubr.bf16.gmra.mrb[32].mxu1 %v3442_v8 }
  0xc0   :  { %566 = vmatprep.mubr.bf16.mxu0 %v3785_v0  ;;  %759 = vmatprep.mubr.bf16.mxu1 %v3785_v0 }
  0xc7   :  { %567 = vmatmul.mubr.bf16.gmra.mrb[36].mxu0 %v3443_v9  ;;  %760 = vmatmul.mubr.bf16.gmra.mrb[36].mxu1 %v3443_v9  ;;  %v3528_v9 = vld [vmem:[#allocation7 + $0x120] ss:$8 sps:$4 sm:$0xff]  }
  0xc8   :  { %576 = vmatprep.mubr.bf16.mxu0 %v3785_v0  ;;  %769 = vmatprep.mubr.bf16.mxu1 %v3785_v0 }
  0xcf   :  { %577 = vmatmul.mubr.bf16.gmra.mrb[40].mxu0 %v3444_v10  ;;  %770 = vmatmul.mubr.bf16.gmra.mrb[40].mxu1 %v3444_v10 }
  0xd0   :  { %586 = vmatprep.mubr.bf16.mxu0 %v3785_v0  ;;  %779 = vmatprep.mubr.bf16.mxu1 %v3785_v0 }
  0xd7   :  { %587 = vmatmul.mubr.bf16.gmra.mrb[44].mxu0 %v3445_v11  ;;  %780 = vmatmul.mubr.bf16.gmra.mrb[44].mxu1 %v3445_v11 }
  0xd8   :  { %596 = vmatprep.mubr.bf16.mxu0 %v3785_v0  ;;  %789 = vmatprep.mubr.bf16.mxu1 %v3785_v0 }
  0xdf   :  { %597 = vmatmul.mubr.bf16.gmra.mrb[48].mxu0 %v3454_v14  ;;  %790 = vmatmul.mubr.bf16.gmra.mrb[48].mxu1 %v3454_v14 }
  0xe0   :  { %606 = vmatprep.mubr.bf16.mxu0 %v3785_v0  ;;  %799 = vmatprep.mubr.bf16.mxu1 %v3785_v0 }
  0xe7   :  { %607 = vmatmul.mubr.bf16.gmra.mrb[52].mxu0 %v3464_v16  ;;  %800 = vmatmul.mubr.bf16.gmra.mrb[52].mxu1 %v3464_v16  ;;  %v3977_v16 = vrot.slane %v3949_v22, %v178_v1 }
  0xe8   :  { %616 = vmatprep.mubr.bf16.mxu0 %v3785_v0  ;;  %809 = vmatprep.mubr.bf16.mxu1 %v3785_v0 }
  0xef   :  { %617 = vmatmul.mubr.bf16.gmra.mrb[56].mxu0 %v3474_v17  ;;  %810 = vmatmul.mubr.bf16.gmra.mrb[56].mxu1 %v3474_v17 }
  0xf0   :  { %626 = vmatprep.mubr.bf16.mxu0 %v3785_v0  ;;  %819 = vmatprep.mubr.bf16.mxu1 %v3785_v0  ;;  %v3960_v0 = vrot.slane %v3949_v22, %v3952_v23 }
  0xf7   :  { %627 = vmatmul.mubr.bf16.gmra.mrb[60].mxu0 %v3484_v18  ;;  %820 = vmatmul.mubr.bf16.gmra.mrb[60].mxu1 %v3484_v18  ;;  %v3980_v18 = vrot.slane %v3949_v22, %v182_v5  ;;  %v3534_v22 = vld [vmem:[#allocation7 + $0x140] ss:$8 sps:$4 sm:$0xff]  }
 0x152   :  { %v478_v25 = vpop.f32.mrb[0].mxu0 }
 0x153   :  { %v479_v26 = vadd.f32 %v478_v25, %v3956_v24  ;;  %v480_v27 = vpop.f32.mrb[1].mxu0 }
 0x154   :  { %v481_v28 = vadd.f32 %v480_v27, %v3960_v0  ;;  %v482_v29 = vpop.f32.mrb[2].mxu0  ;;  %v3536_v27 = vld [vmem:[#allocation7 + $0x144] ss:$8 sps:$4 sm:$0xff]  }
 0x155   :  { %v830_v30 = vmul.f32 0.01, %v479_v26  ;;  %v483_v31 = vadd.f32 %v482_v29, %v3956_v24  ;;  %v484_v32 = vpop.f32.mrb[3].mxu0 }
 0x156   :  { %v831_v33 = vmul.f32 0.01, %v481_v28  ;;  %v485_v34 = vadd.f32 %v484_v32, %v3960_v0 }
 0x157   :  { %v834_v35 = vmul.f32 0.01, %v483_v31  ;;  %v958_v37 = vmax.f32 %v479_v26, %v830_v30 }
 0x158   :  { %v835_v36 = vmul.f32 0.01, %v485_v34  ;;  %v959_v39 = vmax.f32 %v481_v28, %v831_v33  ;;  %v671_v28 = vpop.f32.mrb[0].mxu1 }
 0x159   :  { %v962_v38 = vmax.f32 %v483_v31, %v834_v35  ;;  %v672_v32 = vadd.f32 %v671_v28, %v3977_v16  ;;  %v673_v33 = vpop.f32.mrb[1].mxu1 }
 0x15a   :  { %v963_v40 = vmax.f32 %v485_v34, %v835_v36  ;;  %v488_v41 = vpop.f32.mrb[4].mxu0 }
 0x15b   :  { %v1086_v42 = vpack.c.bf16 %v962_v38, %v958_v37  ;;  %v489_v43 = vadd.f32 %v488_v41, %v3956_v24  ;;  %v490_v44 = vpop.f32.mrb[5].mxu0  ;;  %v674_v37 = vadd.f32 %v673_v33, %v3980_v18  ;;  %v675_v38 = vpop.f32.mrb[2].mxu1 }
 0x15c   :  { %v491_v45 = vadd.f32 %v490_v44, %v3960_v0  ;;  %v492_v46 = vpop.f32.mrb[6].mxu0  ;;  %v1087_v47 = vpack.c.bf16 %v963_v40, %v959_v39  ;;  %v676_v44 = vadd.f32 %v675_v38, %v3977_v16 }
 0x15d   :  { %v838_v49 = vmul.f32 0.01, %v489_v43  ;;  %v493_v50 = vadd.f32 %v492_v46, %v3956_v24  ;;  %v494_v51 = vpop.f32.mrb[7].mxu0 }
 0x15e   :  { %v839_v53 = vmul.f32 0.01, %v491_v45  ;;  %v495_v54 = vadd.f32 %v494_v51, %v3960_v0  ;;  %1578 = vmatprep.mubr.bf16.mxu0 %v1087_v47 }
 0x15f   :  { %v842_v55 = vmul.f32 0.01, %v493_v50  ;;  %1579 = vmatmul.mubr.bf16.vlgmr.msra.gmra.mrb[64].mxu0 %v1086_v42  ;;  %v966_v58 = vmax.f32 %v489_v43, %v838_v49  ;;  %v3539_v42 = vld [vmem:[#allocation7 + $0x154] ss:$8 sps:$4 sm:$0xff]   ;;  %v832_v43 = vmul.f32 0.01, %v672_v32 }
 0x160   :  { %v843_v56 = vmul.f32 0.01, %v495_v54  ;;  %1740 = vmatpush1.bf16.msra.mxu0 %v3522_v48  ;;  %v967_v61 = vmax.f32 %v491_v45, %v839_v53  ;;  %v677_v45 = vpop.f32.mrb[3].mxu1  ;;  %v833_v49 = vmul.f32 0.01, %v674_v37 }
 0x161   :  { %v970_v59 = vmax.f32 %v493_v50, %v842_v55  ;;  %1741 = vmatprep.subr.bf16.mxu0 %v3527_v52  ;;  %v678_v50 = vadd.f32 %v677_v45, %v3980_v18  ;;  %v960_v53 = vmax.f32 %v672_v32, %v832_v43  ;;  %v3548_v45 = vld [vmem:[#allocation7 + $0x184] ss:$8 sps:$4 sm:$0xff]  }
 0x162   :  { %v971_v62 = vmax.f32 %v495_v54, %v843_v56  ;;  %v498_v63 = vpop.f32.mrb[8].mxu0  ;;  %v836_v54 = vmul.f32 0.01, %v676_v44  ;;  %v961_v56 = vmax.f32 %v674_v37, %v833_v49 }
 0x163   :  { %v499_v2 = vadd.f32 %v498_v63, %v3956_v24  ;;  %v500_v3 = vpop.f32.mrb[9].mxu0  ;;  %v1090_v4 = vpack.c.bf16 %v970_v59, %v966_v58  ;;  %v3537_v59 = vld [vmem:[#allocation7 + $0x150] ss:$8 sps:$4 sm:$0xff]   ;;  %v3542_v63 = vld [vmem:[#allocation7 + $0x164] ss:$8 sps:$4 sm:$0xff]  }
 0x164   :  { %v501_v6 = vadd.f32 %v500_v3, %v3960_v0  ;;  %v502_v7 = vpop.f32.mrb[10].mxu0  ;;  %v1091_v8 = vpack.c.bf16 %v971_v62, %v967_v61  ;;  %1742 = vmatpush1.bf16.msra.mxu0 %v3525_v57  ;;  %v837_v57 = vmul.f32 0.01, %v678_v50 }
 0x165   :  { %v846_v10 = vmul.f32 0.01, %v499_v2  ;;  %v503_v11 = vadd.f32 %v502_v7, %v3956_v24  ;;  %v504_v12 = vpop.f32.mrb[11].mxu0  ;;  %1743 = vmatprep.subr.bf16.mxu0 %v3530_v60  ;;  %v964_v60 = vmax.f32 %v676_v44, %v836_v54 }
 0x166   :  { %v847_v14 = vmul.f32 0.01, %v501_v6  ;;  %v505_v15 = vadd.f32 %v504_v12, %v3960_v0  ;;  %1588 = vmatprep.mubr.bf16.mxu0 %v1091_v8  ;;  %v965_v1 = vmax.f32 %v678_v50, %v837_v57  ;;  %v3540_v12 = vld [vmem:[#allocation7 + $0x160] ss:$8 sps:$4 sm:$0xff]  }
 0x167   :  { %v850_v17 = vmul.f32 0.01, %v503_v11  ;;  %1589 = vmatmul.mubr.bf16.gmra.mrb[68].mxu0 %v1090_v4  ;;  %v974_v25 = vmax.f32 %v499_v2, %v846_v10  ;;  %v681_v2 = vpop.f32.mrb[4].mxu1  ;;  %v3546_v57 = vld [vmem:[#allocation7 + $0x180] ss:$8 sps:$4 sm:$0xff]  }
 0x168   :  { %v851_v19 = vmul.f32 0.01, %v505_v15  ;;  %1744 = vmatpush1.bf16.msra.mxu0 %v3528_v9  ;;  %v975_v29 = vmax.f32 %v501_v6, %v847_v14  ;;  %v3990_v6 = vpack.c.bf16 %v964_v60, %v960_v53  ;;  %v682_v7 = vadd.f32 %v681_v2, %v3977_v16  ;;  %v683_v8 = vpop.f32.mrb[5].mxu1 }
 0x169   :  { %v978_v26 = vmax.f32 %v503_v11, %v850_v17  ;;  %1745 = vmatprep.subr.bf16.mxu0 %v3533_v13  ;;  %v684_v13 = vadd.f32 %v683_v8, %v3980_v18  ;;  %v685_v14 = vpop.f32.mrb[6].mxu1 }
 0x16a   :  { %v979_v30 = vmax.f32 %v505_v15, %v851_v19  ;;  %v508_v31 = vpop.f32.mrb[12].mxu0  ;;  %v3995_v15 = vpack.c.bf16 %v965_v1, %v961_v56  ;;  %v687_v28 = vpop.f32.mrb[7].mxu1  ;;  %v3551_v1 = vld [vmem:[#allocation7 + $0x194] ss:$8 sps:$4 sm:$0xff]  }
 0x16b   :  { %v509_v34 = vadd.f32 %v508_v31, %v3956_v24  ;;  %v510_v35 = vpop.f32.mrb[13].mxu0  ;;  %v1094_v36 = vpack.c.bf16 %v978_v26, %v974_v25  ;;  %v3545_v25 = vld [vmem:[#allocation7 + $0x174] ss:$8 sps:$4 sm:$0xff]   ;;  %v840_v26 = vmul.f32 0.01, %v682_v7  ;;  %v688_v33 = vadd.f32 %v687_v28, %v3980_v18 }
 0x16c   :  { %v511_v39 = vadd.f32 %v510_v35, %v3960_v0  ;;  %v512_v40 = vpop.f32.mrb[14].mxu0  ;;  %v1095_v41 = vpack.c.bf16 %v979_v30, %v975_v29  ;;  %1746 = vmatpush1.bf16.msra.mxu0 %v3531_v20  ;;  %v841_v32 = vmul.f32 0.01, %v684_v13 }
 0x16d   :  { %v854_v46 = vmul.f32 0.01, %v509_v34  ;;  %v513_v47 = vadd.f32 %v512_v40, %v3956_v24  ;;  %v514_v48 = vpop.f32.mrb[15].mxu0  ;;  %1747 = vmatprep.subr.bf16.mxu0 %v3536_v27  ;;  %v686_v27 = vadd.f32 %v685_v14, %v3977_v16 }
 0x16e   :  { %v855_v51 = vmul.f32 0.01, %v511_v39  ;;  %v515_v52 = vadd.f32 %v514_v48, %v3960_v0  ;;  %1598 = vmatprep.mubr.bf16.mxu0 %v1095_v41  ;;  %v969_v38 = vmax.f32 %v684_v13, %v841_v32  ;;  %v3543_v41 = vld [vmem:[#allocation7 + $0x170] ss:$8 sps:$4 sm:$0xff]  }
 0x16f   :  { %v858_v55 = vmul.f32 0.01, %v513_v47  ;;  %1599 = vmatmul.mubr.bf16.gmra.mrb[72].mxu0 %v1094_v36  ;;  %v982_v61 = vmax.f32 %v509_v34, %v854_v46  ;;  %v968_v36 = vmax.f32 %v682_v7, %v840_v26  ;;  %v3549_v26 = vld [vmem:[#allocation7 + $0x190] ss:$8 sps:$4 sm:$0xff]  }
 0x170   :  { %v859_v58 = vmul.f32 0.01, %v515_v52  ;;  %1748 = vmatpush1.bf16.msra.mxu0 %v3534_v22  ;;  %v983_v3 = vmax.f32 %v511_v39, %v855_v51  ;;  %v844_v22 = vmul.f32 0.01, %v686_v27  ;;  %v845_v39 = vmul.f32 0.01, %v688_v33 }
 0x171   :  { %v986_v62 = vmax.f32 %v513_v47, %v858_v55  ;;  %1749 = vmatprep.subr.bf16.mxu0 %v3539_v42  ;;  %v691_v47 = vpop.f32.mrb[8].mxu1 }
 0x172   :  { %v987_v4 = vmax.f32 %v515_v52, %v859_v58  ;;  %v518_v5 = vpop.f32.mrb[16].mxu0  ;;  %v972_v42 = vmax.f32 %v686_v27, %v844_v22  ;;  %v973_v46 = vmax.f32 %v688_v33, %v845_v39  ;;  %v692_v51 = vadd.f32 %v691_v47, %v3977_v16  ;;  %v693_v52 = vpop.f32.mrb[9].mxu1 }
 0x173   :  { %v519_v9 = vadd.f32 %v518_v5, %v3956_v24  ;;  %v520_v10 = vpop.f32.mrb[17].mxu0  ;;  %v1098_v11 = vpack.c.bf16 %v986_v62, %v982_v61  ;;  %v694_v58 = vadd.f32 %v693_v52, %v3980_v18 }
 0x174   :  { %v521_v17 = vadd.f32 %v520_v10, %v3960_v0  ;;  %v522_v19 = vpop.f32.mrb[18].mxu0  ;;  %v1099_v20 = vpack.c.bf16 %v987_v4, %v983_v3  ;;  %1750 = vmatpush1.bf16.msra.mxu0 %v3537_v59  ;;  %v4003_v53 = vpack.c.bf16 %v972_v42, %v968_v36  ;;  %v695_v59 = vpop.f32.mrb[10].mxu1  ;;  %v4007_v60 = vpack.c.bf16 %v973_v46, %v969_v38 }
 0x175   :  { %v862_v29 = vmul.f32 0.01, %v519_v9  ;;  %v523_v30 = vadd.f32 %v522_v19, %v3956_v24  ;;  %v524_v31 = vpop.f32.mrb[19].mxu0  ;;  %1751 = vmatprep.subr.bf16.mxu0 %v3542_v63  ;;  %v848_v2 = vmul.f32 0.01, %v692_v51  ;;  %v696_v3 = vadd.f32 %v695_v59, %v3977_v16  ;;  %v697_v4 = vpop.f32.mrb[11].mxu1 }
 0x176   :  { %v863_v34 = vmul.f32 0.01, %v521_v17  ;;  %v525_v35 = vadd.f32 %v524_v31, %v3960_v0  ;;  %1608 = vmatprep.mubr.bf16.mxu0 %v1099_v20  ;;  %v698_v10 = vadd.f32 %v697_v4, %v3980_v18  ;;  %v701_v32 = vpop.f32.mrb[12].mxu1  ;;  %v3555_v4 = vld [vmem:[#allocation7 + $0x1b0] ss:$8 sps:$4 sm:$0xff]  }
 0x177   :  { %v866_v37 = vmul.f32 0.01, %v523_v30  ;;  %1609 = vmatmul.mubr.bf16.gmra.mrb[76].mxu0 %v1098_v11  ;;  %v990_v43 = vmax.f32 %v519_v9, %v862_v29  ;;  %v849_v9 = vmul.f32 0.01, %v694_v58  ;;  %v976_v13 = vmax.f32 %v692_v51, %v848_v2  ;;  %v703_v22 = vpop.f32.mrb[13].mxu1 }
 0x178   :  { %v867_v40 = vmul.f32 0.01, %v525_v35  ;;  %1752 = vmatpush1.bf16.msra.mxu0 %v3540_v12  ;;  %v991_v48 = vmax.f32 %v521_v17, %v863_v34  ;;  %v852_v14 = vmul.f32 0.01, %v696_v3  ;;  %v853_v20 = vmul.f32 0.01, %v698_v10 }
 0x179   :  { %v994_v44 = vmax.f32 %v523_v30, %v866_v37  ;;  %1753 = vmatprep.subr.bf16.mxu0 %v3545_v25  ;;  %v977_v19 = vmax.f32 %v694_v58, %v849_v9  ;;  %v3554_v30 = vld [vmem:[#allocation7 + $0x1a4] ss:$8 sps:$4 sm:$0xff]   ;;  %v702_v36 = vadd.f32 %v701_v32, %v3977_v16  ;;  %v704_v42 = vadd.f32 %v703_v22, %v3980_v18 }
 0x17a   :  { %v995_v49 = vmax.f32 %v525_v35, %v867_v40  ;;  %v528_v50 = vpop.f32.mrb[20].mxu0  ;;  %v980_v27 = vmax.f32 %v696_v3, %v852_v14  ;;  %v981_v31 = vmax.f32 %v698_v10, %v853_v20  ;;  %v3560_v9 = vld [vmem:[#allocation7 + $0x1c4] ss:$8 sps:$4 sm:$0xff]  }
 0x17b   :  { %v529_v54 = vadd.f32 %v528_v50, %v3956_v24  ;;  %v530_v55 = vpop.f32.mrb[21].mxu0  ;;  %v1102_v56 = vpack.c.bf16 %v994_v44, %v990_v43  ;;  %v705_v43 = vpop.f32.mrb[14].mxu1 }
 0x17c   :  { %v531_v61 = vadd.f32 %v530_v55, %v3960_v0  ;;  %v532_v62 = vpop.f32.mrb[22].mxu0  ;;  %v1103_v63 = vpack.c.bf16 %v995_v49, %v991_v48  ;;  %1754 = vmatpush1.bf16.msra.mxu0 %v3543_v41  ;;  %v4015_v37 = vpack.c.bf16 %v980_v27, %v976_v13  ;;  %v3552_v41 = vld [vmem:[#allocation7 + $0x1a0] ss:$8 sps:$4 sm:$0xff]   ;;  %v4019_v44 = vpack.c.bf16 %v981_v31, %v977_v19  ;;  %v3557_v48 = vld [vmem:[#allocation7 + $0x1b4] ss:$8 sps:$4 sm:$0xff]   ;;  %v707_v51 = vpop.f32.mrb[15].mxu1 }
 0x17d   :  { %v870_v5 = vmul.f32 0.01, %v529_v54  ;;  %v533_v7 = vadd.f32 %v532_v62, %v3956_v24  ;;  %v534_v8 = vpop.f32.mrb[23].mxu0  ;;  %1755 = vmatprep.subr.bf16.mxu0 %v3548_v45  ;;  %v856_v49 = vmul.f32 0.01, %v702_v36  ;;  %v706_v50 = vadd.f32 %v705_v43, %v3977_v16 }
 0x17e   :  { %v871_v11 = vmul.f32 0.01, %v531_v61  ;;  %v535_v12 = vadd.f32 %v534_v8, %v3960_v0  ;;  %1618 = vmatprep.mubr.bf16.mxu0 %v1103_v63 }
 0x17f   :  { %v874_v17 = vmul.f32 0.01, %v533_v7  ;;  %1619 = vmatmul.mubr.bf16.gmra.mrb[80].mxu0 %v1102_v56  ;;  %v998_v28 = vmax.f32 %v529_v54, %v870_v5  ;;  %v857_v56 = vmul.f32 0.01, %v704_v42  ;;  %v860_v62 = vmul.f32 0.01, %v706_v50 }
 0x180   :  { %v875_v25 = vmul.f32 0.01, %v535_v12  ;;  %1756 = vmatpush1.bf16.msra.mxu0 %v3546_v57  ;;  %v999_v33 = vmax.f32 %v531_v61, %v871_v11  ;;  %v708_v57 = vadd.f32 %v707_v51, %v3980_v18  ;;  %v984_v61 = vmax.f32 %v702_v36, %v856_v49  ;;  %v711_v11 = vpop.f32.mrb[16].mxu1 }
 0x181   :  { %v1002_v29 = vmax.f32 %v533_v7, %v874_v17  ;;  %1757 = vmatprep.subr.bf16.mxu0 %v3551_v1  ;;  %v985_v1 = vmax.f32 %v704_v42, %v857_v56  ;;  %v988_v5 = vmax.f32 %v706_v50, %v860_v62  ;;  %v712_v17 = vadd.f32 %v711_v11, %v3977_v16  ;;  %v713_v19 = vpop.f32.mrb[17].mxu1 }
 0x182   :  { %v1003_v34 = vmax.f32 %v535_v12, %v875_v25  ;;  %v538_v35 = vpop.f32.mrb[24].mxu0  ;;  %v861_v2 = vmul.f32 0.01, %v708_v57 }
 0x183   :  { %v539_v38 = vadd.f32 %v538_v35, %v3956_v24  ;;  %v540_v39 = vpop.f32.mrb[25].mxu0  ;;  %v1106_v40 = vpack.c.bf16 %v1002_v29, %v998_v28  ;;  %v4027_v20 = vpack.c.bf16 %v988_v5, %v984_v61  ;;  %v3558_v28 = vld [vmem:[#allocation7 + $0x1c0] ss:$8 sps:$4 sm:$0xff]   ;;  %v714_v29 = vadd.f32 %v713_v19, %v3980_v18  ;;  %v3563_v35 = vld [vmem:[#allocation7 + $0x1d4] ss:$8 sps:$4 sm:$0xff]  }
 0x184   :  { %v541_v45 = vadd.f32 %v540_v39, %v3960_v0  ;;  %v542_v46 = vpop.f32.mrb[26].mxu0  ;;  %v1107_v47 = vpack.c.bf16 %v1003_v34, %v999_v33  ;;  %1758 = vmatpush1.bf16.msra.mxu0 %v3549_v26  ;;  %v989_v10 = vmax.f32 %v708_v57, %v861_v2  ;;  %v864_v36 = vmul.f32 0.01, %v712_v17  ;;  %v3569_v19 = vld [vmem:[#allocation7 + $0x1f4] ss:$8 sps:$4 sm:$0xff]  }
 0x185   :  { %v878_v52 = vmul.f32 0.01, %v539_v38  ;;  %v543_v54 = vadd.f32 %v542_v46, %v3956_v24  ;;  %v544_v55 = vpop.f32.mrb[27].mxu0  ;;  %1759 = vmatprep.subr.bf16.mxu0 %v3554_v30  ;;  %v715_v30 = vpop.f32.mrb[18].mxu1  ;;  %v865_v42 = vmul.f32 0.01, %v714_v29 }
 0x186   :  { %v879_v58 = vmul.f32 0.01, %v541_v45  ;;  %v545_v59 = vadd.f32 %v544_v55, %v3960_v0  ;;  %1628 = vmatprep.mubr.bf16.mxu0 %v1107_v47  ;;  %v4031_v31 = vpack.c.bf16 %v989_v10, %v985_v1  ;;  %v716_v22 = vadd.f32 %v715_v30, %v3977_v16 }
 0x187   :  { %v882_v63 = vmul.f32 0.01, %v543_v54  ;;  %1629 = vmatmul.mubr.bf16.gmra.mrb[84].mxu0 %v1106_v40  ;;  %v1006_v7 = vmax.f32 %v539_v38, %v878_v52  ;;  %v717_v38 = vpop.f32.mrb[19].mxu1  ;;  %v992_v47 = vmax.f32 %v712_v17, %v864_v36  ;;  %v993_v50 = vmax.f32 %v714_v29, %v865_v42  ;;  %v3567_v42 = vld [vmem:[#allocation7 + $0x1f0] ss:$8 sps:$4 sm:$0xff]  }
 0x188   :  { %v883_v3 = vmul.f32 0.01, %v545_v59  ;;  %1760 = vmatpush1.bf16.msra.mxu0 %v3552_v41  ;;  %v1007_v12 = vmax.f32 %v541_v45, %v879_v58  ;;  %v718_v43 = vadd.f32 %v717_v38, %v3980_v18  ;;  %v3566_v58 = vld [vmem:[#allocation7 + $0x1e4] ss:$8 sps:$4 sm:$0xff]   ;;  %v721_v61 = vpop.f32.mrb[20].mxu1 }
 0x189   :  { %v1010_v8 = vmax.f32 %v543_v54, %v882_v63  ;;  %1761 = vmatprep.subr.bf16.mxu0 %v3557_v48  ;;  %v868_v48 = vmul.f32 0.01, %v716_v22  ;;  %v3561_v54 = vld [vmem:[#allocation7 + $0x1d0] ss:$8 sps:$4 sm:$0xff]   ;;  %v722_v2 = vadd.f32 %v721_v61, %v3977_v16 }
 0x18a   :  { %v1011_v13 = vmax.f32 %v545_v59, %v883_v3  ;;  %v548_v14 = vpop.f32.mrb[28].mxu0  ;;  %v869_v51 = vmul.f32 0.01, %v718_v43  ;;  %v723_v3 = vpop.f32.mrb[21].mxu1 }
 0x18b   :  { %v549_v25 = vadd.f32 %v548_v14, %v3956_v24  ;;  %v550_v26 = vpop.f32.mrb[29].mxu0  ;;  %v1110_v27 = vpack.c.bf16 %v1010_v8, %v1006_v7  ;;  %v996_v55 = vmax.f32 %v716_v22, %v868_v48  ;;  %v724_v10 = vadd.f32 %v723_v3, %v3980_v18  ;;  %v725_v11 = vpop.f32.mrb[22].mxu1 }
 0x18c   :  { %v551_v32 = vadd.f32 %v550_v26, %v3960_v0  ;;  %v552_v33 = vpop.f32.mrb[30].mxu0  ;;  %v1111_v34 = vpack.c.bf16 %v1011_v13, %v1007_v12  ;;  %1762 = vmatpush1.bf16.msra.mxu0 %v3555_v4  ;;  %v997_v59 = vmax.f32 %v718_v43, %v869_v51  ;;  %v726_v26 = vadd.f32 %v725_v11, %v3977_v16 }
 0x18d   :  { %v886_v39 = vmul.f32 0.01, %v549_v25  ;;  %v553_v40 = vadd.f32 %v552_v33, %v3956_v24  ;;  %v554_v41 = vpop.f32.mrb[31].mxu0  ;;  %1763 = vmatprep.subr.bf16.mxu0 %v3560_v9  ;;  %v4039_v4 = vpack.c.bf16 %v996_v55, %v992_v47  ;;  %v3564_v9 = vld [vmem:[#allocation7 + $0x1e0] ss:$8 sps:$4 sm:$0xff]  }
 0x18e   :  { %v887_v45 = vmul.f32 0.01, %v551_v32  ;;  %v555_v46 = vadd.f32 %v554_v41, %v3960_v0  ;;  %1638 = vmatprep.mubr.bf16.mxu0 %v1111_v34  ;;  %v4043_v12 = vpack.c.bf16 %v997_v59, %v993_v50  ;;  %v876_v22 = vmul.f32 0.01, %v726_v26 }
 0x18f   :  { %v890_v49 = vmul.f32 0.01, %v553_v40  ;;  %1639 = vmatmul.mubr.bf16.gmra.mrb[88].mxu0 %v1110_v27  ;;  %v1014_v56 = vmax.f32 %v549_v25, %v886_v39  ;;  %v872_v25 = vmul.f32 0.01, %v722_v2  ;;  %v727_v27 = vpop.f32.mrb[23].mxu1 }
 0x190   :  { %v891_v52 = vmul.f32 0.01, %v555_v46  ;;  %1764 = vmatpush1.bf16.msra.mxu0 %v3558_v28  ;;  %v1015_v62 = vmax.f32 %v551_v32, %v887_v45  ;;  %v873_v32 = vmul.f32 0.01, %v724_v10  ;;  %v728_v33 = vadd.f32 %v727_v27, %v3980_v18  ;;  %v731_v48 = vpop.f32.mrb[24].mxu1 }
 0x191   :  { %v1018_v57 = vmax.f32 %v553_v40, %v890_v49  ;;  %1765 = vmatprep.subr.bf16.mxu0 %v3563_v35  ;;  %v1000_v36 = vmax.f32 %v722_v2, %v872_v25  ;;  %v1004_v43 = vmax.f32 %v726_v26, %v876_v22 }
 0x192   :  { %v1019_v63 = vmax.f32 %v555_v46, %v891_v52  ;;  %v558_v1 = vpop.f32.mrb[32].mxu0  ;;  %v1001_v39 = vmax.f32 %v724_v10, %v873_v32  ;;  %v877_v40 = vmul.f32 0.01, %v728_v33  ;;  %v732_v52 = vadd.f32 %v731_v48, %v3977_v16 }
 0x193   :  { %v559_v5 = vadd.f32 %v558_v1, %v3956_v24  ;;  %v560_v7 = vpop.f32.mrb[33].mxu0  ;;  %v1114_v8 = vpack.c.bf16 %v1018_v57, %v1014_v56  ;;  %v4051_v55 = vpack.c.bf16 %v1004_v43, %v1000_v36 }
 0x194   :  { %v561_v13 = vadd.f32 %v560_v7, %v3960_v0  ;;  %v562_v14 = vpop.f32.mrb[34].mxu0  ;;  %v1115_v17 = vpack.c.bf16 %v1019_v63, %v1015_v62  ;;  %1766 = vmatpush1.bf16.msra.mxu0 %v3561_v54  ;;  %v1005_v47 = vmax.f32 %v728_v33, %v877_v40  ;;  %v733_v54 = vpop.f32.mrb[25].mxu1  ;;  %v880_v3 = vmul.f32 0.01, %v732_v52 }
 0x195   :  { %v894_v28 = vmul.f32 0.01, %v559_v5  ;;  %v563_v29 = vadd.f32 %v562_v14, %v3956_v24  ;;  %v564_v30 = vpop.f32.mrb[35].mxu0  ;;  %1767 = vmatprep.subr.bf16.mxu0 %v3566_v58  ;;  %v734_v59 = vadd.f32 %v733_v54, %v3980_v18  ;;  %v735_v61 = vpop.f32.mrb[26].mxu1 }
 0x196   :  { %v895_v34 = vmul.f32 0.01, %v561_v13  ;;  %v565_v35 = vadd.f32 %v564_v30, %v3960_v0  ;;  %1648 = vmatprep.mubr.bf16.mxu0 %v1115_v17  ;;  %v4055_v62 = vpack.c.bf16 %v1005_v47, %v1001_v39  ;;  %v737_v7 = vpop.f32.mrb[27].mxu1 }
 0x197   :  { %v898_v38 = vmul.f32 0.01, %v563_v29  ;;  %1649 = vmatmul.mubr.bf16.gmra.mrb[92].mxu0 %v1114_v8  ;;  %v1022_v45 = vmax.f32 %v559_v5, %v894_v28  ;;  %v736_v5 = vadd.f32 %v735_v61, %v3977_v16  ;;  %v881_v11 = vmul.f32 0.01, %v734_v59 }
 0x198   :  { %v899_v41 = vmul.f32 0.01, %v565_v35  ;;  %1768 = vmatpush1.bf16.msra.mxu0 %v3564_v9  ;;  %v1023_v49 = vmax.f32 %v561_v13, %v895_v34  ;;  %v738_v13 = vadd.f32 %v737_v7, %v3980_v18 }
 0x199   :  { %v1026_v46 = vmax.f32 %v563_v29, %v898_v38  ;;  %1769 = vmatprep.subr.bf16.mxu0 %v3569_v19  ;;  %v1008_v19 = vmax.f32 %v732_v52, %v880_v3  ;;  %v884_v25 = vmul.f32 0.01, %v736_v5  ;;  %v1009_v27 = vmax.f32 %v734_v59, %v881_v11 }
 0x19a   :  { %v1027_v50 = vmax.f32 %v565_v35, %v899_v41  ;;  %v568_v51 = vpop.f32.mrb[36].mxu0  ;;  %v885_v28 = vmul.f32 0.01, %v738_v13  ;;  %v741_v35 = vpop.f32.mrb[28].mxu1 }
 0x19b   :  { %v569_v56 = vadd.f32 %v568_v51, %v3956_v24  ;;  %v570_v57 = vpop.f32.mrb[37].mxu0  ;;  %v1118_v58 = vpack.c.bf16 %v1026_v46, %v1022_v45  ;;  %v1012_v30 = vmax.f32 %v736_v5, %v884_v25  ;;  %v742_v39 = vadd.f32 %v741_v35, %v3977_v16  ;;  %v743_v40 = vpop.f32.mrb[29].mxu1 }
 0x19c   :  { %v571_v63 = vadd.f32 %v570_v57, %v3960_v0  ;;  %v572_v1 = vpop.f32.mrb[38].mxu0  ;;  %v1119_v2 = vpack.c.bf16 %v1027_v50, %v1023_v49  ;;  %1770 = vmatpush1.bf16.msra.mxu0 %v3567_v42  ;;  %v1013_v34 = vmax.f32 %v738_v13, %v885_v28  ;;  %v744_v46 = vadd.f32 %v743_v40, %v3980_v18  ;;  %v745_v47 = vpop.f32.mrb[30].mxu1 }
 0x19d   :  { %v902_v8 = vmul.f32 0.01, %v569_v56  ;;  %v573_v9 = vadd.f32 %v572_v1, %v3956_v24  ;;  %v574_v10 = vpop.f32.mrb[39].mxu0  ;;  %v4063_v41 = vpack.c.bf16 %v1012_v30, %v1008_v19  ;;  %v888_v52 = vmul.f32 0.01, %v742_v39 }
 0x19e   :  { %v903_v14 = vmul.f32 0.01, %v571_v63  ;;  %v575_v17 = vadd.f32 %v574_v10, %v3960_v0  ;;  %1658 = vmatprep.mubr.bf16.mxu0 %v1119_v2  ;;  %v4067_v48 = vpack.c.bf16 %v1013_v34, %v1009_v27  ;;  %v746_v54 = vadd.f32 %v745_v47, %v3977_v16 }
 0x19f   :  { %v906_v26 = vmul.f32 0.01, %v573_v9  ;;  %1659 = vmatmul.mubr.bf16.gmra.mrb[96].mxu0 %v1118_v58  ;;  %v1030_v32 = vmax.f32 %v569_v56, %v902_v8  ;;  %v747_v56 = vpop.f32.mrb[31].mxu1  ;;  %v889_v61 = vmul.f32 0.01, %v744_v46  ;;  %v1016_v3 = vmax.f32 %v742_v39, %v888_v52 }
 0x1a0   :  { %v907_v29 = vmul.f32 0.01, %v575_v17  ;;  %v1031_v36 = vmax.f32 %v571_v63, %v903_v14  ;;  %v748_v63 = vadd.f32 %v747_v56, %v3980_v18  ;;  %v892_v5 = vmul.f32 0.01, %v746_v54  ;;  %v751_v19 = vpop.f32.mrb[32].mxu1 }
 0x1a1   :  { %v1034_v33 = vmax.f32 %v573_v9, %v906_v26  ;;  %v1017_v8 = vmax.f32 %v744_v46, %v889_v61  ;;  %v752_v28 = vadd.f32 %v751_v19, %v3977_v16 }
 0x1a2   :  { %v1035_v22 = vmax.f32 %v575_v17, %v907_v29  ;;  %v578_v38 = vpop.f32.mrb[40].mxu0  ;;  %v893_v9 = vmul.f32 0.01, %v748_v63  ;;  %v1020_v11 = vmax.f32 %v746_v54, %v892_v5  ;;  %v753_v29 = vpop.f32.mrb[33].mxu1 }
 0x1a3   :  { %v579_v42 = vadd.f32 %v578_v38, %v3956_v24  ;;  %v580_v43 = vpop.f32.mrb[41].mxu0  ;;  %v1122_v45 = vpack.c.bf16 %v1034_v33, %v1030_v32  ;;  %v754_v35 = vadd.f32 %v753_v29, %v3980_v18 }
 0x1a4   :  { %v581_v49 = vadd.f32 %v580_v43, %v3960_v0  ;;  %v582_v50 = vpop.f32.mrb[42].mxu0  ;;  %v1123_v51 = vpack.c.bf16 %v1035_v22, %v1031_v36  ;;  %v1021_v17 = vmax.f32 %v748_v63, %v893_v9  ;;  %v4075_v30 = vpack.c.bf16 %v1020_v11, %v1016_v3  ;;  %v755_v36 = vpop.f32.mrb[34].mxu1 }
 0x1a5   :  { %v910_v57 = vmul.f32 0.01, %v579_v42  ;;  %v583_v58 = vadd.f32 %v582_v50, %v3956_v24  ;;  %v584_v59 = vpop.f32.mrb[43].mxu0  ;;  %v756_v43 = vadd.f32 %v755_v36, %v3977_v16  ;;  %v897_v50 = vmul.f32 0.01, %v754_v35 }
 0x1a6   :  { %v911_v1 = vmul.f32 0.01, %v581_v49  ;;  %v585_v2 = vadd.f32 %v584_v59, %v3960_v0  ;;  %1668 = vmatprep.mubr.bf16.mxu0 %v1123_v51  ;;  %v4079_v22 = vpack.c.bf16 %v1021_v17, %v1017_v8 }
 0x1a7   :  { %v914_v7 = vmul.f32 0.01, %v583_v58  ;;  %1669 = vmatmul.mubr.bf16.gmra.mrb[100].mxu0 %v1122_v45  ;;  %v1038_v13 = vmax.f32 %v579_v42, %v910_v57  ;;  %v896_v42 = vmul.f32 0.01, %v752_v28  ;;  %v757_v45 = vpop.f32.mrb[35].mxu1  ;;  %v1025_v59 = vmax.f32 %v754_v35, %v897_v50 }
 0x1a8   :  { %v915_v10 = vmul.f32 0.01, %v585_v2  ;;  %v1039_v25 = vmax.f32 %v581_v49, %v911_v1  ;;  %v758_v51 = vadd.f32 %v757_v45, %v3980_v18  ;;  %v900_v57 = vmul.f32 0.01, %v756_v43 }
 0x1a9   :  { %v1042_v14 = vmax.f32 %v583_v58, %v914_v7  ;;  %v1024_v56 = vmax.f32 %v752_v28, %v896_v42  ;;  %v761_v7 = vpop.f32.mrb[36].mxu1 }
 0x1aa   :  { %v1043_v26 = vmax.f32 %v585_v2, %v915_v10  ;;  %v588_v27 = vpop.f32.mrb[44].mxu0  ;;  %v901_v61 = vmul.f32 0.01, %v758_v51  ;;  %v1028_v1 = vmax.f32 %v756_v43, %v900_v57  ;;  %v762_v11 = vadd.f32 %v761_v7, %v3977_v16  ;;  %v3570_v57 = vld [vmem:[#allocation8] ss:$8 sps:$4 sm:$0xff]  }
 0x1ab   :  { %v589_v32 = vadd.f32 %v588_v27, %v3956_v24  ;;  %v590_v33 = vpop.f32.mrb[45].mxu0  ;;  %v1126_v34 = vpack.c.bf16 %v1042_v14, %v1038_v13  ;;  %v763_v13 = vpop.f32.mrb[37].mxu1 }
 0x1ac   :  { %v591_v38 = vadd.f32 %v590_v33, %v3960_v0  ;;  %v592_v39 = vpop.f32.mrb[46].mxu0  ;;  %v1127_v40 = vpack.c.bf16 %v1043_v26, %v1039_v25  ;;  %v1029_v5 = vmax.f32 %v758_v51, %v901_v61  ;;  %v4087_v14 = vpack.c.bf16 %v1028_v1, %v1024_v56  ;;  %v765_v27 = vpop.f32.mrb[38].mxu1 }
 0x1ad   :  { %v918_v46 = vmul.f32 0.01, %v589_v32  ;;  %v593_v47 = vadd.f32 %v592_v39, %v3956_v24  ;;  %v594_v49 = vpop.f32.mrb[47].mxu0  ;;  %v764_v26 = vadd.f32 %v763_v13, %v3980_v18  ;;  %v766_v35 = vadd.f32 %v765_v27, %v3977_v16  ;;  %v767_v36 = vpop.f32.mrb[39].mxu1 }
 0x1ae   :  { %v919_v52 = vmul.f32 0.01, %v591_v38  ;;  %v595_v54 = vadd.f32 %v594_v49, %v3960_v0  ;;  %1678 = vmatprep.mubr.bf16.mxu0 %v1127_v40  ;;  %v4091_v28 = vpack.c.bf16 %v1029_v5, %v1025_v59  ;;  %v768_v43 = vadd.f32 %v767_v36, %v3980_v18  ;;  %v771_v1 = vpop.f32.mrb[40].mxu1 }
 0x1af   :  { %v922_v58 = vmul.f32 0.01, %v593_v47  ;;  %1679 = vmatmul.mubr.bf16.gmra.mrb[104].mxu0 %v1126_v34  ;;  %v1046_v2 = vmax.f32 %v589_v32, %v918_v46  ;;  %v904_v34 = vmul.f32 0.01, %v762_v11  ;;  %v905_v42 = vmul.f32 0.01, %v764_v26 }
 0x1b0   :  { %v923_v63 = vmul.f32 0.01, %v595_v54  ;;  %v1047_v8 = vmax.f32 %v591_v38, %v919_v52  ;;  %v908_v49 = vmul.f32 0.01, %v766_v35  ;;  %v909_v52 = vmul.f32 0.01, %v768_v43 }
 0x1b1   :  { %v1050_v3 = vmax.f32 %v593_v47, %v922_v58  ;;  %v1032_v47 = vmax.f32 %v762_v11, %v904_v34  ;;  %v1033_v51 = vmax.f32 %v764_v26, %v905_v42  ;;  %v3572_v58 = vld [vmem:[#allocation8 + $0x4] ss:$8 sps:$4 sm:$0xff]   ;;  %v772_v7 = vadd.f32 %v771_v1, %v3977_v16 }
 0x1b2   :  { %v1051_v9 = vmax.f32 %v595_v54, %v923_v63  ;;  %v598_v10 = vpop.f32.mrb[48].mxu0  ;;  %v1036_v56 = vmax.f32 %v766_v35, %v908_v49  ;;  %v1037_v63 = vmax.f32 %v768_v43, %v909_v52  ;;  %2296 = vmatprep.subr.bf16.mxu1 %v3572_v58 }
 0x1b3   :  { %v599_v17 = vadd.f32 %v598_v10, %v3956_v24  ;;  %v600_v19 = vpop.f32.mrb[49].mxu0  ;;  %v1130_v25 = vpack.c.bf16 %v1050_v3, %v1046_v2  ;;  %2297 = vmatpush1.bf16.msra.mxu1 %v3570_v57 }
 0x1b4   :  { %v601_v29 = vadd.f32 %v600_v19, %v3960_v0  ;;  %v602_v32 = vpop.f32.mrb[50].mxu0  ;;  %v1131_v33 = vpack.c.bf16 %v1051_v9, %v1047_v8  ;;  %v773_v8 = vpop.f32.mrb[41].mxu1  ;;  %v4099_v9 = vpack.c.bf16 %v1036_v56, %v1032_v47  ;;  %v3575_v56 = vld [vmem:[#allocation8 + $0x14] ss:$8 sps:$4 sm:$0xff]  }
 0x1b5   :  { %v926_v38 = vmul.f32 0.01, %v599_v17  ;;  %v603_v39 = vadd.f32 %v602_v32, %v3956_v24  ;;  %v604_v40 = vpop.f32.mrb[51].mxu0  ;;  %v774_v19 = vadd.f32 %v773_v8, %v3980_v18  ;;  %v912_v32 = vmul.f32 0.01, %v772_v7  ;;  %2298 = vmatprep.subr.bf16.mxu1 %v3575_v56 }
 0x1b6   :  { %v927_v45 = vmul.f32 0.01, %v601_v29  ;;  %v605_v46 = vadd.f32 %v604_v40, %v3960_v0  ;;  %1688 = vmatprep.mubr.bf16.mxu0 %v1131_v33  ;;  %v3578_v56 = vld [vmem:[#allocation8 + $0x24] ss:$8 sps:$4 sm:$0xff]  }
 0x1b7   :  { %v930_v50 = vmul.f32 0.01, %v603_v39  ;;  %1689 = vmatmul.mubr.bf16.gmra.mrb[108].mxu0 %v1130_v25  ;;  %v1054_v59 = vmax.f32 %v599_v17, %v926_v38  ;;  %v775_v25 = vpop.f32.mrb[42].mxu1  ;;  %v4103_v17 = vpack.c.bf16 %v1037_v63, %v1033_v51 }
 0x1b8   :  { %v931_v54 = vmul.f32 0.01, %v605_v46  ;;  %v1055_v2 = vmax.f32 %v601_v29, %v927_v45  ;;  %v776_v33 = vadd.f32 %v775_v25, %v3977_v16  ;;  %v777_v34 = vpop.f32.mrb[43].mxu1  ;;  %v1040_v45 = vmax.f32 %v772_v7, %v912_v32 }
 0x1b9   :  { %v1058_v61 = vmax.f32 %v603_v39, %v930_v50  ;;  %v913_v39 = vmul.f32 0.01, %v774_v19  ;;  %v778_v40 = vadd.f32 %v777_v34, %v3980_v18 }
 0x1ba   :  { %v1059_v3 = vmax.f32 %v605_v46, %v931_v54  ;;  %v608_v5 = vpop.f32.mrb[52].mxu0  ;;  %v916_v46 = vmul.f32 0.01, %v776_v33  ;;  %v3573_v54 = vld [vmem:[#allocation8 + $0x10] ss:$8 sps:$4 sm:$0xff]  }
 0x1bb   :  { %v609_v10 = vadd.f32 %v608_v5, %v3956_v24  ;;  %v610_v11 = vpop.f32.mrb[53].mxu0  ;;  %v1134_v13 = vpack.c.bf16 %v1058_v61, %v1054_v59  ;;  %v1041_v49 = vmax.f32 %v774_v19, %v913_v39  ;;  %v917_v50 = vmul.f32 0.01, %v778_v40  ;;  %v781_v61 = vpop.f32.mrb[44].mxu1  ;;  %2299 = vmatpush1.bf16.msra.mxu1 %v3573_v54  ;;  %v3576_v54 = vld [vmem:[#allocation8 + $0x20] ss:$8 sps:$4 sm:$0xff]  }
 0x1bc   :  { %v611_v26 = vadd.f32 %v610_v11, %v3960_v0  ;;  %v612_v27 = vpop.f32.mrb[54].mxu0  ;;  %v1135_v29 = vpack.c.bf16 %v1059_v3, %v1055_v2  ;;  %v1044_v52 = vmax.f32 %v776_v33, %v916_v46  ;;  %v782_v3 = vadd.f32 %v781_v61, %v3977_v16  ;;  %v783_v5 = vpop.f32.mrb[45].mxu1  ;;  %2300 = vmatprep.subr.bf16.mxu1 %v3578_v56 }
 0x1bd   :  { %v934_v35 = vmul.f32 0.01, %v609_v10  ;;  %v613_v36 = vadd.f32 %v612_v27, %v3956_v24  ;;  %v614_v38 = vpop.f32.mrb[55].mxu0  ;;  %v1045_v59 = vmax.f32 %v778_v40, %v917_v50  ;;  %v784_v19 = vadd.f32 %v783_v5, %v3980_v18  ;;  %v785_v25 = vpop.f32.mrb[46].mxu1 }
 0x1be   :  { %v935_v42 = vmul.f32 0.01, %v611_v26  ;;  %v615_v43 = vadd.f32 %v614_v38, %v3960_v0  ;;  %1698 = vmatprep.mubr.bf16.mxu0 %v1135_v29  ;;  %v4111_v7 = vpack.c.bf16 %v1044_v52, %v1040_v45  ;;  %v920_v32 = vmul.f32 0.01, %v782_v3  ;;  %v787_v34 = vpop.f32.mrb[47].mxu1 }
 0x1bf   :  { %v938_v47 = vmul.f32 0.01, %v613_v36  ;;  %1699 = vmatmul.mubr.bf16.gmra.mrb[112].mxu0 %v1134_v13  ;;  %v1062_v57 = vmax.f32 %v609_v10, %v934_v35  ;;  %v4115_v10 = vpack.c.bf16 %v1045_v59, %v1041_v49  ;;  %v786_v33 = vadd.f32 %v785_v25, %v3977_v16  ;;  %v791_v61 = vpop.f32.mrb[48].mxu1  ;;  %2301 = vmatpush1.bf16.msra.mxu1 %v3576_v54 }
 0x1c0   :  { %v939_v51 = vmul.f32 0.01, %v615_v43  ;;  %v1063_v63 = vmax.f32 %v611_v26, %v935_v42  ;;  %v921_v39 = vmul.f32 0.01, %v784_v19  ;;  %v788_v40 = vadd.f32 %v787_v34, %v3980_v18 }
 0x1c1   :  { %v1066_v58 = vmax.f32 %v613_v36, %v938_v47  ;;  %v1048_v45 = vmax.f32 %v782_v3, %v920_v32  ;;  %v924_v46 = vmul.f32 0.01, %v786_v33  ;;  %v792_v5 = vadd.f32 %v791_v61, %v3977_v16 }
 0x1c2   :  { %v1067_v1 = vmax.f32 %v615_v43, %v939_v51  ;;  %v618_v2 = vpop.f32.mrb[56].mxu0  ;;  %v1049_v49 = vmax.f32 %v784_v19, %v921_v39  ;;  %v925_v50 = vmul.f32 0.01, %v788_v40 }
 0x1c3   :  { %v619_v8 = vadd.f32 %v618_v2, %v3956_v24  ;;  %v620_v11 = vpop.f32.mrb[57].mxu0  ;;  %v1138_v13 = vpack.c.bf16 %v1066_v58, %v1062_v57  ;;  %v1052_v52 = vmax.f32 %v786_v33, %v924_v46  ;;  %v928_v34 = vmul.f32 0.01, %v792_v5 }
 0x1c4   :  { %v621_v26 = vadd.f32 %v620_v11, %v3960_v0  ;;  %v622_v27 = vpop.f32.mrb[58].mxu0  ;;  %v1139_v29 = vpack.c.bf16 %v1067_v1, %v1063_v63  ;;  %v1053_v59 = vmax.f32 %v788_v40, %v925_v50  ;;  %v793_v11 = vpop.f32.mrb[49].mxu1 }
 0x1c5   :  { %v942_v35 = vmul.f32 0.01, %v619_v8  ;;  %v623_v36 = vadd.f32 %v622_v27, %v3956_v24  ;;  %v624_v38 = vpop.f32.mrb[59].mxu0  ;;  %v4123_v3 = vpack.c.bf16 %v1052_v52, %v1048_v45  ;;  %v794_v27 = vadd.f32 %v793_v11, %v3980_v18 }
 0x1c6   :  { %v943_v42 = vmul.f32 0.01, %v621_v26  ;;  %v625_v43 = vadd.f32 %v624_v38, %v3960_v0  ;;  %1708 = vmatprep.mubr.bf16.mxu0 %v1139_v29  ;;  %v795_v29 = vpop.f32.mrb[50].mxu1 }
 0x1c7   :  { %v946_v47 = vmul.f32 0.01, %v623_v36  ;;  %1709 = vmatmul.mubr.bf16.gmra.mrb[116].mxu0 %v1138_v13  ;;  %v1070_v57 = vmax.f32 %v619_v8, %v942_v35  ;;  %v4127_v8 = vpack.c.bf16 %v1053_v59, %v1049_v49  ;;  %v796_v35 = vadd.f32 %v795_v29, %v3977_v16 }
 0x1c8   :  { %v947_v51 = vmul.f32 0.01, %v625_v43  ;;  %v1071_v63 = vmax.f32 %v621_v26, %v943_v42  ;;  %v929_v42 = vmul.f32 0.01, %v794_v27 }
 0x1c9   :  { %v1074_v58 = vmax.f32 %v623_v36, %v946_v47  ;;  %v797_v36 = vpop.f32.mrb[51].mxu1  ;;  %v1056_v47 = vmax.f32 %v792_v5, %v928_v34  ;;  %v932_v49 = vmul.f32 0.01, %v796_v35 }
 0x1ca   :  { %v1075_v1 = vmax.f32 %v625_v43, %v947_v51  ;;  %v628_v2 = vpop.f32.mrb[60].mxu0  ;;  %v798_v43 = vadd.f32 %v797_v36, %v3980_v18  ;;  %v1057_v51 = vmax.f32 %v794_v27, %v929_v42  ;;  %v3582_v42 = vld [vmem:[#allocation8 + $0x40] ss:$8 sps:$4 sm:$0xff]  }
 0x1cb   :  { %v629_v13 = vadd.f32 %v628_v2, %v3956_v24  ;;  %v630_v19 = vpop.f32.mrb[61].mxu0  ;;  %v1142_v25 = vpack.c.bf16 %v1074_v58, %v1070_v57  ;;  %v1060_v56 = vmax.f32 %v796_v35, %v932_v49  ;;  %v3579_v57 = vld [vmem:[#allocation8 + $0x30] ss:$8 sps:$4 sm:$0xff]   ;;  %v3581_v58 = vld [vmem:[#allocation8 + $0x34] ss:$8 sps:$4 sm:$0xff]  }
 0x1cc   :  { %v631_v26 = vadd.f32 %v630_v19, %v3960_v0  ;;  %v632_v32 = vpop.f32.mrb[62].mxu0  ;;  %v1143_v33 = vpack.c.bf16 %v1075_v1, %v1071_v63  ;;  %v933_v52 = vmul.f32 0.01, %v798_v43  ;;  %v801_v63 = vpop.f32.mrb[52].mxu1  ;;  %2302 = vmatprep.subr.bf16.mxu1 %v3581_v58 }
 0x1cd   :  { %v950_v38 = vmul.f32 0.01, %v629_v13  ;;  %v633_v39 = vadd.f32 %v632_v32, %v3956_v24  ;;  %v634_v40 = vpop.f32.mrb[63].mxu0  ;;  %v802_v11 = vadd.f32 %v801_v63, %v3977_v16  ;;  %v4135_v19 = vpack.c.bf16 %v1060_v56, %v1056_v47  ;;  %2303 = vmatpush1.bf16.msra.mxu1 %v3579_v57 }
 0x1ce   :  { %v951_v45 = vmul.f32 0.01, %v631_v26  ;;  %v635_v46 = vadd.f32 %v634_v40, %v3960_v0  ;;  %1718 = vmatprep.mubr.bf16.mxu0 %v1143_v33  ;;  %v1061_v61 = vmax.f32 %v798_v43, %v933_v52  ;;  %v803_v0 = vpop.f32.mrb[53].mxu1  ;;  %v3584_v43 = vld [vmem:[#allocation8 + $0x44] ss:$8 sps:$4 sm:$0xff]  }
 0x1cf   :  { %v954_v50 = vmul.f32 0.01, %v633_v39  ;;  %1719 = vmatmul.mubr.bf16.gmra.mrb[120].mxu0 %v1142_v25  ;;  %v1078_v59 = vmax.f32 %v629_v13, %v950_v38  ;;  %v804_v25 = vadd.f32 %v803_v0, %v3980_v18  ;;  %v805_v27 = vpop.f32.mrb[54].mxu1  ;;  %v936_v13 = vmul.f32 0.01, %v802_v11  ;;  %2304 = vmatprep.subr.bf16.mxu1 %v3584_v43 }
 0x1d0   :  { %v955_v54 = vmul.f32 0.01, %v635_v46  ;;  %v1079_v1 = vmax.f32 %v631_v26, %v951_v45  ;;  %v4138_v29 = vpack.c.bf16 %v1061_v61, %v1057_v51  ;;  %v806_v33 = vadd.f32 %v805_v27, %v3977_v16  ;;  %v807_v34 = vpop.f32.mrb[55].mxu1  ;;  %v3588_v0 = vld [vmem:[#allocation8 + $0x60] ss:$8 sps:$4 sm:$0xff]  }
 0x1d1   :  { %v1082_v24 = vmax.f32 %v633_v39, %v954_v50  ;;  %v937_v26 = vmul.f32 0.01, %v804_v25  ;;  %v808_v35 = vadd.f32 %v807_v34, %v3980_v18  ;;  %v1064_v36 = vmax.f32 %v802_v11, %v936_v13  ;;  %v811_v49 = vpop.f32.mrb[56].mxu1  ;;  %2305 = vmatpush1.bf16.msra.mxu1 %v3582_v42  ;;  %v3593_v27 = vld [vmem:[#allocation8 + $0x74] ss:$8 sps:$4 sm:$0xff]  }
 0x1d2   :  { %v1083_v2 = vmax.f32 %v635_v46, %v955_v54  ;;  %v940_v38 = vmul.f32 0.01, %v806_v33  ;;  %v3587_v46 = vld [vmem:[#allocation8 + $0x54] ss:$8 sps:$4 sm:$0xff]   ;;  %v812_v50 = vadd.f32 %v811_v49, %v3977_v16  ;;  %v813_v51 = vpop.f32.mrb[57].mxu1 }
 0x1d3   :  { %v1146_v5 = vpack.c.bf16 %v1082_v24, %v1078_v59  ;;  %v1065_v39 = vmax.f32 %v804_v25, %v937_v26  ;;  %v941_v40 = vmul.f32 0.01, %v808_v35  ;;  %v3585_v54 = vld [vmem:[#allocation8 + $0x50] ss:$8 sps:$4 sm:$0xff]   ;;  %v814_v56 = vadd.f32 %v813_v51, %v3980_v18  ;;  %v815_v57 = vpop.f32.mrb[58].mxu1  ;;  %2306 = vmatprep.subr.bf16.mxu1 %v3587_v46 }
 0x1d4   :  { %v1147_v32 = vpack.c.bf16 %v1083_v2, %v1079_v1  ;;  %v1068_v45 = vmax.f32 %v806_v33, %v940_v38  ;;  %v3590_v59 = vld [vmem:[#allocation8 + $0x64] ss:$8 sps:$4 sm:$0xff]   ;;  %v816_v24 = vadd.f32 %v815_v57, %v3977_v16  ;;  %v817_v61 = vpop.f32.mrb[59].mxu1 }
 0x1d5   :  { %v1069_v47 = vmax.f32 %v808_v35, %v941_v40  ;;  %v945_v63 = vmul.f32 0.01, %v814_v56  ;;  %v818_v1 = vadd.f32 %v817_v61, %v3980_v18  ;;  %2307 = vmatpush1.bf16.msra.mxu1 %v3585_v54  ;;  %v821_v33 = vpop.f32.mrb[60].mxu1  ;;  %v3596_v40 = vld [vmem:[#allocation8 + $0x84] ss:$8 sps:$4 sm:$0xff]  }
 0x1d6   :  { %1728 = vmatprep.mubr.bf16.mxu0 %v1147_v32  ;;  %v4144_v52 = vpack.c.bf16 %v1068_v45, %v1064_v36  ;;  %v948_v11 = vmul.f32 0.01, %v816_v24  ;;  %2308 = vmatprep.subr.bf16.mxu1 %v3590_v59  ;;  %v822_v34 = vadd.f32 %v821_v33, %v3977_v16  ;;  %v823_v26 = vpop.f32.mrb[61].mxu1  ;;  %v3591_v36 = vld [vmem:[#allocation8 + $0x70] ss:$8 sps:$4 sm:$0xff]  }
 0x1d7   :  { %1729 = vmatmul.mubr.bf16.gmra.mrb[124].mxu0 %v1146_v5  ;;  %v4147_v58 = vpack.c.bf16 %v1069_v47, %v1065_v39  ;;  %v1073_v5 = vmax.f32 %v814_v56, %v945_v63  ;;  %v949_v25 = vmul.f32 0.01, %v818_v1  ;;  %v824_v38 = vadd.f32 %v823_v26, %v3980_v18  ;;  %v825_v39 = vpop.f32.mrb[62].mxu1  ;;  %v3599_v56 = vld [vmem:[#allocation8 + $0x94] ss:$8 sps:$4 sm:$0xff]   ;;  %v3619_v26 = vld [vmem:[#allocation10] sm:$0xff]  }
 0x1d8   :  { %1771 = vmatprep.mubr.bf16.mxu0 %v3995_v15  ;;  %v944_v15 = vmul.f32 0.01, %v812_v50  ;;  %v1076_v32 = vmax.f32 %v816_v24, %v948_v11  ;;  %v952_v42 = vmul.f32 0.01, %v822_v34  ;;  %v827_v43 = vpop.f32.mrb[63].mxu1 }
 0x1d9   :  { %v1077_v13 = vmax.f32 %v818_v1, %v949_v25  ;;  %2309 = vmatpush1.bf16.msra.mxu1 %v3588_v0  ;;  %v953_v45 = vmul.f32 0.01, %v824_v38  ;;  %v828_v46 = vadd.f32 %v827_v43, %v3980_v18  ;;  %v3602_v18 = vld [vmem:[#allocation8 + $0xa4] ss:$8 sps:$4 sm:$0xff]   ;;  %v3600_v61 = vld [vmem:[#allocation8 + $0xa0] ss:$8 sps:$4 sm:$0xff]  }
 0x1da   :  { %v1072_v2 = vmax.f32 %v812_v50, %v944_v15  ;;  %2310 = vmatprep.subr.bf16.mxu1 %v3593_v27  ;;  %v1080_v47 = vmax.f32 %v822_v34, %v952_v42  ;;  %v3594_v50 = vld [vmem:[#allocation8 + $0x80] ss:$8 sps:$4 sm:$0xff]   ;;  %v3603_v63 = vld [vmem:[#allocation8 + $0xb0] ss:$8 sps:$4 sm:$0xff]  }
 0x1db   :  { %v1081_v51 = vmax.f32 %v824_v38, %v953_v45  ;;  %v957_v54 = vmul.f32 0.01, %v828_v46  ;;  %v3606_v1 = vld [vmem:[#allocation8 + $0xc0] ss:$8 sps:$4 sm:$0xff]   ;;  %v3609_v11 = vld [vmem:[#allocation8 + $0xd0] ss:$8 sps:$4 sm:$0xff]  }
 0x1dc   :  { %v4154_v35 = vpack.c.bf16 %v1076_v32, %v1072_v2  ;;  %v3611_v2 = vld [vmem:[#allocation8 + $0xd4] ss:$8 sps:$4 sm:$0xff]   ;;  %v3612_v0 = vld [vmem:[#allocation8 + $0xe0] ss:$8 sps:$4 sm:$0xff]  }
 0x1dd   :  { %2311 = vmatpush1.bf16.msra.mxu1 %v3591_v36  ;;  %v1085_v59 = vmax.f32 %v828_v46, %v957_v54  ;;  %v3621_v43 = vld [vmem:[#allocation10 + $0x8] sm:$0xff]  }
 0x1de   :  { %2312 = vmatprep.subr.bf16.mxu1 %v3596_v40 }
 0x1df   :  { %1772 = vmatmul.mubr.bf16.vlgmr.msra.gmra.mrb[64].mxu0 %v3990_v6  ;;  %v4157_v6 = vpack.c.bf16 %v1077_v13, %v1073_v5  ;;  %v1149_v24 = vpack.c.bf16 %v1085_v59, %v1081_v51 }
 0x1e0   :  { %1781 = vmatprep.mubr.bf16.mxu0 %v4007_v60  ;;  %v826_v60 = vadd.f32 %v825_v39, %v3977_v16  ;;  %v3597_v16 = vld [vmem:[#allocation8 + $0x90] ss:$8 sps:$4 sm:$0xff]   ;;  %v3620_v39 = vld [vmem:[#allocation10 + $0x48] sm:$0xff]  }
 0x1e1   :  { %2313 = vmatpush1.bf16.msra.mxu1 %v3594_v50 }
 0x1e2   :  { %v956_v49 = vmul.f32 0.01, %v826_v60  ;;  %2314 = vmatprep.subr.bf16.mxu1 %v3599_v56 }
 0x1e4   :  { %v1084_v57 = vmax.f32 %v826_v60, %v956_v49 }
 0x1e5   :  { %2315 = vmatpush1.bf16.msra.mxu1 %v3597_v16 }
 0x1e6   :  { %v1148_v15 = vpack.c.bf16 %v1084_v57, %v1080_v47  ;;  %2316 = vmatprep.subr.bf16.mxu1 %v3602_v18  ;;  %v3622_v47 = vld [vmem:[#allocation10 + $0x50] sm:$0xff]  }
 0x1e7   :  { %1782 = vmatmul.mubr.bf16.gmra.mrb[68].mxu0 %v4003_v53  ;;  %v3605_v53 = vld [vmem:[#allocation8 + $0xb4] ss:$8 sps:$4 sm:$0xff]  }
 0x1e8   :  { %1791 = vmatprep.mubr.bf16.mxu0 %v4019_v44  ;;  %v3608_v44 = vld [vmem:[#allocation8 + $0xc4] ss:$8 sps:$4 sm:$0xff]  }
 0x1e9   :  { %2317 = vmatpush1.bf16.msra.mxu1 %v3600_v61 }
 0x1ea   :  { %2318 = vmatprep.subr.bf16.mxu1 %v3605_v53 }
 0x1ed   :  { %2319 = vmatpush1.bf16.msra.mxu1 %v3603_v63  ;;  %v3624_v63 = vld [vmem:[#allocation10 + $0x58] sm:$0xff]  }
 0x1ee   :  { %2320 = vmatprep.subr.bf16.mxu1 %v3608_v44 }
 0x1ef   :  { %1792 = vmatmul.mubr.bf16.gmra.mrb[72].mxu0 %v4015_v37  ;;  %v3614_v37 = vld [vmem:[#allocation8 + $0xe4] ss:$8 sps:$4 sm:$0xff]  }
 0x1f0   :  { %1801 = vmatprep.mubr.bf16.mxu0 %v4031_v31  ;;  %v3615_v31 = vld [vmem:[#allocation8 + $0xf0] ss:$8 sps:$4 sm:$0xff]  }
 0x1f1   :  { %2321 = vmatpush1.bf16.msra.mxu1 %v3606_v1 }
 0x1f2   :  { %2322 = vmatprep.subr.bf16.mxu1 %v3611_v2 }
 0x1f5   :  { %2323 = vmatpush1.bf16.msra.mxu1 %v3609_v11 }
 0x1f6   :  { %2324 = vmatprep.subr.bf16.mxu1 %v3614_v37  ;;  %v3625_v37 = vld [vmem:[#allocation10 + $0x18] sm:$0xff]  }
 0x1f7   :  { %1802 = vmatmul.mubr.bf16.gmra.mrb[76].mxu0 %v4027_v20  ;;  %v3617_v20 = vld [vmem:[#allocation8 + $0xf4] ss:$8 sps:$4 sm:$0xff]  }
 0x1f8   :  { %1811 = vmatprep.mubr.bf16.mxu0 %v4043_v12  ;;  %v1214_v12 = vld [vmem:[%s4390_s4] sm:$0x3] }
 0x1f9   :  { %2325 = vmatpush1.bf16.msra.mxu1 %v3612_v0 }
 0x1fa   :  { %2326 = vmatprep.subr.bf16.mxu1 %v3617_v20 }
 0x1fd   :  { %2327 = vmatpush1.bf16.msra.mxu1 %v3615_v31  ;;  %v3626_v31 = vld [vmem:[#allocation10 + $0x60] sm:$0xff]  }
 0x1ff   :  { %1812 = vmatmul.mubr.bf16.gmra.mrb[80].mxu0 %v4039_v4  ;;  %v3618_v4 = vld [vmem:[#allocation10 + $0x40] sm:$0xff]  }
 0x200   :  { %1821 = vmatprep.mubr.bf16.mxu0 %v4055_v62  ;;  %3157 = vmatprep.subr.bf16.mxu1 %v3618_v4  ;;  %v4195_v62 = vrot.slane %v1214_v12, %v3952_v23 }
 0x207   :  { %1822 = vmatmul.mubr.bf16.gmra.mrb[84].mxu0 %v4051_v55  ;;  %v4192_v55 = vrot.slane %v1214_v12, %v3944_v21 }
 0x208   :  { %1831 = vmatprep.mubr.bf16.mxu0 %v4067_v48 }
 0x20f   :  { %1832 = vmatmul.mubr.bf16.gmra.mrb[88].mxu0 %v4063_v41 }
 0x210   :  { %1841 = vmatprep.mubr.bf16.mxu0 %v4079_v22 }
 0x217   :  { %1842 = vmatmul.mubr.bf16.gmra.mrb[92].mxu0 %v4075_v30 }
 0x218   :  { %1851 = vmatprep.mubr.bf16.mxu0 %v4091_v28 }
 0x21f   :  { %1852 = vmatmul.mubr.bf16.gmra.mrb[96].mxu0 %v4087_v14 }
 0x220   :  { %1861 = vmatprep.mubr.bf16.mxu0 %v4103_v17 }
 0x227   :  { %1862 = vmatmul.mubr.bf16.gmra.mrb[100].mxu0 %v4099_v9 }
 0x228   :  { %1871 = vmatprep.mubr.bf16.mxu0 %v4115_v10 }
 0x22f   :  { %1872 = vmatmul.mubr.bf16.gmra.mrb[104].mxu0 %v4111_v7 }
 0x230   :  { %1881 = vmatprep.mubr.bf16.mxu0 %v4127_v8 }
 0x237   :  { %1882 = vmatmul.mubr.bf16.gmra.mrb[108].mxu0 %v4123_v3 }
 0x238   :  { %1891 = vmatprep.mubr.bf16.mxu0 %v4138_v29 }
 0x23f   :  { %1892 = vmatmul.mubr.bf16.gmra.mrb[112].mxu0 %v4135_v19 }
 0x240   :  { %1901 = vmatprep.mubr.bf16.mxu0 %v4147_v58 }
 0x247   :  { %1902 = vmatmul.mubr.bf16.gmra.mrb[116].mxu0 %v4144_v52 }
 0x248   :  { %1911 = vmatprep.mubr.bf16.mxu0 %v4157_v6 }
 0x24f   :  { %1912 = vmatmul.mubr.bf16.gmra.mrb[120].mxu0 %v4154_v35 }
 0x250   :  { %1921 = vmatprep.mubr.bf16.mxu0 %v1149_v24  ;;  %v3623_v24 = vld [vmem:[#allocation10 + $0x10] sm:$0xff]  }
 0x257   :  { %1922 = vmatmul.mubr.bf16.gmra.mrb[124].mxu0 %v1148_v15 }
 0x2b2   :  { %v1773_v41 = vpop.f32.mrb[64].mxu0 }
 0x2b3   :  { %v3269_v48 = vadd.f32 %v1773_v41, %v4192_v55  ;;  %v1775_v30 = vpop.f32.mrb[65].mxu0 }
 0x2b4   :  { %v3270_v22 = vadd.f32 %v1775_v30, %v4195_v62  ;;  %v1777_v14 = vpop.f32.mrb[66].mxu0 }
 0x2b5   :  { %v1932_v28 = vmul.f32 0.01, %v3269_v48  ;;  %v3271_v9 = vadd.f32 %v1777_v14, %v4192_v55  ;;  %v1779_v17 = vpop.f32.mrb[67].mxu0 }
 0x2b6   :  { %v1933_v7 = vmul.f32 0.01, %v3270_v22  ;;  %v3272_v10 = vadd.f32 %v1779_v17, %v4195_v62  ;;  %v3627_v17 = vld [vmem:[#allocation10 + $0x20] sm:$0xff]  }
 0x2b7   :  { %v1934_v3 = vmul.f32 0.01, %v3271_v9  ;;  %v1996_v19 = vmax.f32 %v3269_v48, %v1932_v28 }
 0x2b8   :  { %v1935_v8 = vmul.f32 0.01, %v3272_v10  ;;  %v1997_v52 = vmax.f32 %v3270_v22, %v1933_v7 }
 0x2b9   :  { %v1998_v29 = vmax.f32 %v3271_v9, %v1934_v3 }
 0x2ba   :  { %v1999_v58 = vmax.f32 %v3272_v10, %v1935_v8  ;;  %v1783_v5 = vpop.f32.mrb[68].mxu0  ;;  %v3628_v8 = vld [vmem:[#allocation10 + $0x68] sm:$0xff]  }
 0x2bb   :  { %v2060_v25 = vpack.c.bf16 %v1998_v29, %v1996_v19  ;;  %v3273_v27 = vadd.f32 %v1783_v5, %v4192_v55  ;;  %v1785_v32 = vpop.f32.mrb[69].mxu0  ;;  %v3629_v5 = vld [vmem:[#allocation10 + $0x28] sm:$0xff]  }
 0x2bc   :  { %v3274_v13 = vadd.f32 %v1785_v32, %v4195_v62  ;;  %v1787_v33 = vpop.f32.mrb[70].mxu0  ;;  %v2061_v34 = vpack.c.bf16 %v1999_v58, %v1997_v52  ;;  %v3630_v32 = vld [vmem:[#allocation10 + $0x70] sm:$0xff]  }
 0x2bd   :  { %v1936_v35 = vmul.f32 0.01, %v3273_v27  ;;  %v3275_v36 = vadd.f32 %v1787_v33, %v4192_v55  ;;  %v1789_v38 = vpop.f32.mrb[71].mxu0 }
 0x2be   :  { %v1937_v6 = vmul.f32 0.01, %v3274_v13  ;;  %v3276_v40 = vadd.f32 %v1789_v38, %v4195_v62  ;;  %2328 = vmatprep.mubr.bf16.mxu1 %v2061_v34 }
 0x2bf   :  { %v1938_v42 = vmul.f32 0.01, %v3275_v36  ;;  %2329 = vmatmul.mubr.bf16.vlgmr.msra.gmra.mrb[64].mxu1 %v2060_v25  ;;  %v2000_v45 = vmax.f32 %v3273_v27, %v1936_v35 }
 0x2c0   :  { %v1939_v60 = vmul.f32 0.01, %v3276_v40  ;;  %3158 = vmatpush3.bf16.msra.mxu1 %v3619_v26  ;;  %v2001_v49 = vmax.f32 %v3274_v13, %v1937_v6 }
 0x2c1   :  { %v2002_v46 = vmax.f32 %v3275_v36, %v1938_v42  ;;  %3159 = vmatprep.subr.bf16.mxu1 %v3620_v39 }
 0x2c2   :  { %v2003_v50 = vmax.f32 %v3276_v40, %v1939_v60  ;;  %v1793_v51 = vpop.f32.mrb[72].mxu0  ;;  %v3631_v40 = vld [vmem:[#allocation10 + $0x30] sm:$0xff]  }
 0x2c3   :  { %v3277_v54 = vadd.f32 %v1793_v51, %v4192_v55  ;;  %v1795_v56 = vpop.f32.mrb[73].mxu0  ;;  %v2062_v57 = vpack.c.bf16 %v2002_v46, %v2000_v45  ;;  %v3632_v45 = vld [vmem:[#allocation10 + $0x78] sm:$0xff]  }
 0x2c4   :  { %v3278_v59 = vadd.f32 %v1795_v56, %v4195_v62  ;;  %v1797_v15 = vpop.f32.mrb[74].mxu0  ;;  %v2063_v16 = vpack.c.bf16 %v2003_v50, %v2001_v49  ;;  %3160 = vmatpush3.bf16.msra.mxu1 %v3621_v43  ;;  %v3633_v51 = vld [vmem:[#allocation10 + $0x38] sm:$0xff]  }
 0x2c5   :  { %v1940_v18 = vmul.f32 0.01, %v3277_v54  ;;  %v3279_v61 = vadd.f32 %v1797_v15, %v4192_v55  ;;  %v1799_v53 = vpop.f32.mrb[75].mxu0  ;;  %3161 = vmatprep.subr.bf16.mxu1 %v3622_v47 }
 0x2c6   :  { %v1941_v44 = vmul.f32 0.01, %v3278_v59  ;;  %v3280_v1 = vadd.f32 %v1799_v53, %v4195_v62  ;;  %2338 = vmatprep.mubr.bf16.mxu1 %v2063_v16 }
 0x2c7   :  { %v1942_v2 = vmul.f32 0.01, %v3279_v61  ;;  %2339 = vmatmul.mubr.bf16.gmra.mrb[68].mxu1 %v2062_v57  ;;  %v2004_v0 = vmax.f32 %v3277_v54, %v1940_v18 }
 0x2c8   :  { %v1943_v11 = vmul.f32 0.01, %v3280_v1  ;;  %3162 = vmatpush3.bf16.msra.mxu1 %v3623_v24  ;;  %v2005_v4 = vmax.f32 %v3278_v59, %v1941_v44 }
 0x2c9   :  { %v2006_v20 = vmax.f32 %v3279_v61, %v1942_v2  ;;  %3163 = vmatprep.subr.bf16.mxu1 %v3624_v63 }
 0x2ca   :  { %v2007_v12 = vmax.f32 %v3280_v1, %v1943_v11  ;;  %v1803_v41 = vpop.f32.mrb[76].mxu0 }
 0x2cb   :  { %v3281_v48 = vadd.f32 %v1803_v41, %v4192_v55  ;;  %v1805_v30 = vpop.f32.mrb[77].mxu0  ;;  %v2064_v22 = vpack.c.bf16 %v2006_v20, %v2004_v0 }
 0x2cc   :  { %v3282_v14 = vadd.f32 %v1805_v30, %v4195_v62  ;;  %v1807_v28 = vpop.f32.mrb[78].mxu0  ;;  %v2065_v9 = vpack.c.bf16 %v2007_v12, %v2005_v4  ;;  %3164 = vmatpush3.bf16.msra.mxu1 %v3625_v37 }
 0x2cd   :  { %v1944_v7 = vmul.f32 0.01, %v3281_v48  ;;  %v3283_v10 = vadd.f32 %v1807_v28, %v4192_v55  ;;  %v1809_v3 = vpop.f32.mrb[79].mxu0  ;;  %3165 = vmatprep.subr.bf16.mxu1 %v3626_v31 }
 0x2ce   :  { %v1945_v19 = vmul.f32 0.01, %v3282_v14  ;;  %v3284_v29 = vadd.f32 %v1809_v3, %v4195_v62  ;;  %2348 = vmatprep.mubr.bf16.mxu1 %v2065_v9 }
 0x2cf   :  { %v1946_v52 = vmul.f32 0.01, %v3283_v10  ;;  %2349 = vmatmul.mubr.bf16.gmra.mrb[72].mxu1 %v2064_v22  ;;  %v2008_v25 = vmax.f32 %v3281_v48, %v1944_v7 }
 0x2d0   :  { %v1947_v58 = vmul.f32 0.01, %v3284_v29  ;;  %3166 = vmatpush3.bf16.msra.mxu1 %v3627_v17  ;;  %v2009_v13 = vmax.f32 %v3282_v14, %v1945_v19 }
 0x2d1   :  { %v2010_v27 = vmax.f32 %v3283_v10, %v1946_v52  ;;  %3167 = vmatprep.subr.bf16.mxu1 %v3628_v8 }
 0x2d2   :  { %v2011_v33 = vmax.f32 %v3284_v29, %v1947_v58  ;;  %v1813_v34 = vpop.f32.mrb[80].mxu0 }
 0x2d3   :  { %v3285_v26 = vadd.f32 %v1813_v34, %v4192_v55  ;;  %v1815_v35 = vpop.f32.mrb[81].mxu0  ;;  %v2066_v36 = vpack.c.bf16 %v2010_v27, %v2008_v25 }
 0x2d4   :  { %v3286_v38 = vadd.f32 %v1815_v35, %v4195_v62  ;;  %v1817_v39 = vpop.f32.mrb[82].mxu0  ;;  %v2067_v6 = vpack.c.bf16 %v2011_v33, %v2009_v13  ;;  %3168 = vmatpush3.bf16.msra.mxu1 %v3629_v5 }
 0x2d5   :  { %v1948_v42 = vmul.f32 0.01, %v3285_v26  ;;  %v3287_v60 = vadd.f32 %v1817_v39, %v4192_v55  ;;  %v1819_v43 = vpop.f32.mrb[83].mxu0  ;;  %3169 = vmatprep.subr.bf16.mxu1 %v3630_v32 }
 0x2d6   :  { %v1949_v46 = vmul.f32 0.01, %v3286_v38  ;;  %v3288_v47 = vadd.f32 %v1819_v43, %v4195_v62  ;;  %2358 = vmatprep.mubr.bf16.mxu1 %v2067_v6 }
 0x2d7   :  { %v1950_v49 = vmul.f32 0.01, %v3287_v60  ;;  %2359 = vmatmul.mubr.bf16.gmra.mrb[76].mxu1 %v2066_v36  ;;  %v2012_v54 = vmax.f32 %v3285_v26, %v1948_v42 }
 0x2d8   :  { %v1951_v50 = vmul.f32 0.01, %v3288_v47  ;;  %3170 = vmatpush3.bf16.msra.mxu1 %v3631_v40  ;;  %v2013_v57 = vmax.f32 %v3286_v38, %v1949_v46 }
 0x2d9   :  { %v2014_v56 = vmax.f32 %v3287_v60, %v1950_v49  ;;  %3171 = vmatprep.subr.bf16.mxu1 %v3632_v45 }
 0x2da   :  { %v2015_v59 = vmax.f32 %v3288_v47, %v1951_v50  ;;  %v1823_v15 = vpop.f32.mrb[84].mxu0 }
 0x2db   :  { %v3289_v16 = vadd.f32 %v1823_v15, %v4192_v55  ;;  %v1825_v24 = vpop.f32.mrb[85].mxu0  ;;  %v2068_v18 = vpack.c.bf16 %v2014_v56, %v2012_v54 }
 0x2dc   :  { %v3290_v61 = vadd.f32 %v1825_v24, %v4195_v62  ;;  %v1827_v53 = vpop.f32.mrb[86].mxu0  ;;  %v2069_v63 = vpack.c.bf16 %v2015_v59, %v2013_v57  ;;  %3172 = vmatpush3.bf16.msra.mxu1 %v3633_v51 }
 0x2dd   :  { %v1952_v44 = vmul.f32 0.01, %v3289_v16  ;;  %v3291_v1 = vadd.f32 %v1827_v53, %v4192_v55  ;;  %v1829_v2 = vpop.f32.mrb[87].mxu0 }
 0x2de   :  { %v1953_v11 = vmul.f32 0.01, %v3290_v61  ;;  %v3292_v37 = vadd.f32 %v1829_v2, %v4195_v62  ;;  %2368 = vmatprep.mubr.bf16.mxu1 %v2069_v63 }
 0x2df   :  { %v1954_v0 = vmul.f32 0.01, %v3291_v1  ;;  %2369 = vmatmul.mubr.bf16.gmra.mrb[80].mxu1 %v2068_v18  ;;  %v2016_v31 = vmax.f32 %v3289_v16, %v1952_v44 }
 0x2e0   :  { %v1955_v20 = vmul.f32 0.01, %v3292_v37  ;;  %v2017_v12 = vmax.f32 %v3290_v61, %v1953_v11 }
 0x2e1   :  { %v2018_v4 = vmax.f32 %v3291_v1, %v1954_v0 }
 0x2e2   :  { %v2019_v41 = vmax.f32 %v3292_v37, %v1955_v20  ;;  %v1833_v48 = vpop.f32.mrb[88].mxu0 }
 0x2e3   :  { %v3293_v30 = vadd.f32 %v1833_v48, %v4192_v55  ;;  %v1835_v22 = vpop.f32.mrb[89].mxu0  ;;  %v2070_v14 = vpack.c.bf16 %v2018_v4, %v2016_v31 }
 0x2e4   :  { %v3294_v28 = vadd.f32 %v1835_v22, %v4195_v62  ;;  %v1837_v9 = vpop.f32.mrb[90].mxu0  ;;  %v2071_v17 = vpack.c.bf16 %v2019_v41, %v2017_v12 }
 0x2e5   :  { %v1956_v7 = vmul.f32 0.01, %v3293_v30  ;;  %v3295_v10 = vadd.f32 %v1837_v9, %v4192_v55  ;;  %v1839_v3 = vpop.f32.mrb[91].mxu0 }
 0x2e6   :  { %v1957_v8 = vmul.f32 0.01, %v3294_v28  ;;  %v3296_v19 = vadd.f32 %v1839_v3, %v4195_v62  ;;  %2378 = vmatprep.mubr.bf16.mxu1 %v2071_v17 }
 0x2e7   :  { %v1958_v29 = vmul.f32 0.01, %v3295_v10  ;;  %2379 = vmatmul.mubr.bf16.gmra.mrb[84].mxu1 %v2070_v14  ;;  %v2020_v58 = vmax.f32 %v3293_v30, %v1956_v7 }
 0x2e8   :  { %v1959_v52 = vmul.f32 0.01, %v3296_v19  ;;  %v2021_v25 = vmax.f32 %v3294_v28, %v1957_v8 }
 0x2e9   :  { %v2022_v5 = vmax.f32 %v3295_v10, %v1958_v29 }
 0x2ea   :  { %v2023_v27 = vmax.f32 %v3296_v19, %v1959_v52  ;;  %v1843_v32 = vpop.f32.mrb[92].mxu0 }
 0x2eb   :  { %v3297_v13 = vadd.f32 %v1843_v32, %v4192_v55  ;;  %v1845_v33 = vpop.f32.mrb[93].mxu0  ;;  %v2072_v34 = vpack.c.bf16 %v2022_v5, %v2020_v58 }
 0x2ec   :  { %v3298_v26 = vadd.f32 %v1845_v33, %v4195_v62  ;;  %v1847_v35 = vpop.f32.mrb[94].mxu0  ;;  %v2073_v36 = vpack.c.bf16 %v2023_v27, %v2021_v25 }
 0x2ed   :  { %v1960_v38 = vmul.f32 0.01, %v3297_v13  ;;  %v3299_v39 = vadd.f32 %v1847_v35, %v4192_v55  ;;  %v1849_v6 = vpop.f32.mrb[95].mxu0 }
 0x2ee   :  { %v1961_v40 = vmul.f32 0.01, %v3298_v26  ;;  %v3300_v42 = vadd.f32 %v1849_v6, %v4195_v62  ;;  %2388 = vmatprep.mubr.bf16.mxu1 %v2073_v36 }
 0x2ef   :  { %v1962_v60 = vmul.f32 0.01, %v3299_v39  ;;  %2389 = vmatmul.mubr.bf16.gmra.mrb[88].mxu1 %v2072_v34  ;;  %v2024_v45 = vmax.f32 %v3297_v13, %v1960_v38 }
 0x2f0   :  { %v1963_v43 = vmul.f32 0.01, %v3300_v42  ;;  %v2025_v47 = vmax.f32 %v3298_v26, %v1961_v40 }
 0x2f1   :  { %v2026_v46 = vmax.f32 %v3299_v39, %v1962_v60 }
 0x2f2   :  { %v2027_v49 = vmax.f32 %v3300_v42, %v1963_v43  ;;  %v1853_v50 = vpop.f32.mrb[96].mxu0 }
 0x2f3   :  { %v3301_v51 = vadd.f32 %v1853_v50, %v4192_v55  ;;  %v1855_v54 = vpop.f32.mrb[97].mxu0  ;;  %v2074_v56 = vpack.c.bf16 %v2026_v46, %v2024_v45 }
 0x2f4   :  { %v3302_v57 = vadd.f32 %v1855_v54, %v4195_v62  ;;  %v1857_v59 = vpop.f32.mrb[98].mxu0  ;;  %v2075_v15 = vpack.c.bf16 %v2027_v49, %v2025_v47 }
 0x2f5   :  { %v1964_v16 = vmul.f32 0.01, %v3301_v51  ;;  %v3303_v24 = vadd.f32 %v1857_v59, %v4192_v55  ;;  %v1859_v18 = vpop.f32.mrb[99].mxu0 }
 0x2f6   :  { %v1965_v61 = vmul.f32 0.01, %v3302_v57  ;;  %v3304_v53 = vadd.f32 %v1859_v18, %v4195_v62  ;;  %2398 = vmatprep.mubr.bf16.mxu1 %v2075_v15 }
 0x2f7   :  { %v1966_v63 = vmul.f32 0.01, %v3303_v24  ;;  %2399 = vmatmul.mubr.bf16.gmra.mrb[92].mxu1 %v2074_v56  ;;  %v2028_v1 = vmax.f32 %v3301_v51, %v1964_v16 }
 0x2f8   :  { %v1967_v44 = vmul.f32 0.01, %v3304_v53  ;;  %v2029_v11 = vmax.f32 %v3302_v57, %v1965_v61 }
 0x2f9   :  { %v2030_v2 = vmax.f32 %v3303_v24, %v1966_v63 }
 0x2fa   :  { %v2031_v37 = vmax.f32 %v3304_v53, %v1967_v44  ;;  %v1863_v0 = vpop.f32.mrb[100].mxu0 }
 0x2fb   :  { %v3305_v20 = vadd.f32 %v1863_v0, %v4192_v55  ;;  %v1865_v31 = vpop.f32.mrb[101].mxu0  ;;  %v2076_v4 = vpack.c.bf16 %v2030_v2, %v2028_v1 }
 0x2fc   :  { %v3306_v12 = vadd.f32 %v1865_v31, %v4195_v62  ;;  %v1867_v41 = vpop.f32.mrb[102].mxu0  ;;  %v2077_v48 = vpack.c.bf16 %v2031_v37, %v2029_v11 }
 0x2fd   :  { %v1968_v30 = vmul.f32 0.01, %v3305_v20  ;;  %v3307_v22 = vadd.f32 %v1867_v41, %v4192_v55  ;;  %v1869_v14 = vpop.f32.mrb[103].mxu0 }
 0x2fe   :  { %v1969_v28 = vmul.f32 0.01, %v3306_v12  ;;  %v3308_v9 = vadd.f32 %v1869_v14, %v4195_v62  ;;  %2408 = vmatprep.mubr.bf16.mxu1 %v2077_v48 }
 0x2ff   :  { %v1970_v17 = vmul.f32 0.01, %v3307_v22  ;;  %2409 = vmatmul.mubr.bf16.gmra.mrb[96].mxu1 %v2076_v4  ;;  %v2032_v10 = vmax.f32 %v3305_v20, %v1968_v30 }
 0x300   :  { %v1971_v7 = vmul.f32 0.01, %v3308_v9  ;;  %v2033_v8 = vmax.f32 %v3306_v12, %v1969_v28 }
 0x301   :  { %v2034_v3 = vmax.f32 %v3307_v22, %v1970_v17 }
 0x302   :  { %v2035_v19 = vmax.f32 %v3308_v9, %v1971_v7  ;;  %v1873_v29 = vpop.f32.mrb[104].mxu0 }
 0x303   :  { %v3309_v52 = vadd.f32 %v1873_v29, %v4192_v55  ;;  %v1875_v58 = vpop.f32.mrb[105].mxu0  ;;  %v2078_v5 = vpack.c.bf16 %v2034_v3, %v2032_v10 }
 0x304   :  { %v3310_v25 = vadd.f32 %v1875_v58, %v4195_v62  ;;  %v1877_v27 = vpop.f32.mrb[106].mxu0  ;;  %v2079_v32 = vpack.c.bf16 %v2035_v19, %v2033_v8 }
 0x305   :  { %v1972_v13 = vmul.f32 0.01, %v3309_v52  ;;  %v3311_v33 = vadd.f32 %v1877_v27, %v4192_v55  ;;  %v1879_v34 = vpop.f32.mrb[107].mxu0 }
 0x306   :  { %v1973_v26 = vmul.f32 0.01, %v3310_v25  ;;  %v3312_v35 = vadd.f32 %v1879_v34, %v4195_v62  ;;  %2418 = vmatprep.mubr.bf16.mxu1 %v2079_v32 }
 0x307   :  { %v1974_v36 = vmul.f32 0.01, %v3311_v33  ;;  %2419 = vmatmul.mubr.bf16.gmra.mrb[100].mxu1 %v2078_v5  ;;  %v2036_v39 = vmax.f32 %v3309_v52, %v1972_v13 }
 0x308   :  { %v1975_v38 = vmul.f32 0.01, %v3312_v35  ;;  %v2037_v40 = vmax.f32 %v3310_v25, %v1973_v26 }
 0x309   :  { %v2038_v6 = vmax.f32 %v3311_v33, %v1974_v36 }
 0x30a   :  { %v2039_v42 = vmax.f32 %v3312_v35, %v1975_v38  ;;  %v1883_v60 = vpop.f32.mrb[108].mxu0 }
 0x30b   :  { %v3313_v43 = vadd.f32 %v1883_v60, %v4192_v55  ;;  %v1885_v45 = vpop.f32.mrb[109].mxu0  ;;  %v2080_v46 = vpack.c.bf16 %v2038_v6, %v2036_v39 }
 0x30c   :  { %v3314_v47 = vadd.f32 %v1885_v45, %v4195_v62  ;;  %v1887_v49 = vpop.f32.mrb[110].mxu0  ;;  %v2081_v50 = vpack.c.bf16 %v2039_v42, %v2037_v40 }
 0x30d   :  { %v1976_v51 = vmul.f32 0.01, %v3313_v43  ;;  %v3315_v54 = vadd.f32 %v1887_v49, %v4192_v55  ;;  %v1889_v56 = vpop.f32.mrb[111].mxu0 }
 0x30e   :  { %v1977_v57 = vmul.f32 0.01, %v3314_v47  ;;  %v3316_v59 = vadd.f32 %v1889_v56, %v4195_v62  ;;  %2428 = vmatprep.mubr.bf16.mxu1 %v2081_v50 }
 0x30f   :  { %v1978_v15 = vmul.f32 0.01, %v3315_v54  ;;  %2429 = vmatmul.mubr.bf16.gmra.mrb[104].mxu1 %v2080_v46  ;;  %v2040_v24 = vmax.f32 %v3313_v43, %v1976_v51 }
 0x310   :  { %v1979_v16 = vmul.f32 0.01, %v3316_v59  ;;  %v2041_v61 = vmax.f32 %v3314_v47, %v1977_v57 }
 0x311   :  { %v2042_v18 = vmax.f32 %v3315_v54, %v1978_v15 }
 0x312   :  { %v2043_v53 = vmax.f32 %v3316_v59, %v1979_v16  ;;  %v1893_v63 = vpop.f32.mrb[112].mxu0 }
 0x313   :  { %v3317_v44 = vadd.f32 %v1893_v63, %v4192_v55  ;;  %v1895_v1 = vpop.f32.mrb[113].mxu0  ;;  %v2082_v2 = vpack.c.bf16 %v2042_v18, %v2040_v24 }
 0x314   :  { %v3318_v11 = vadd.f32 %v1895_v1, %v4195_v62  ;;  %v1897_v37 = vpop.f32.mrb[114].mxu0  ;;  %v2083_v0 = vpack.c.bf16 %v2043_v53, %v2041_v61 }
 0x315   :  { %v1980_v20 = vmul.f32 0.01, %v3317_v44  ;;  %v3319_v31 = vadd.f32 %v1897_v37, %v4192_v55  ;;  %v1899_v4 = vpop.f32.mrb[115].mxu0 }
 0x316   :  { %v1981_v12 = vmul.f32 0.01, %v3318_v11  ;;  %v3320_v41 = vadd.f32 %v1899_v4, %v4195_v62  ;;  %2438 = vmatprep.mubr.bf16.mxu1 %v2083_v0 }
 0x317   :  { %v1982_v48 = vmul.f32 0.01, %v3319_v31  ;;  %2439 = vmatmul.mubr.bf16.gmra.mrb[108].mxu1 %v2082_v2  ;;  %v2044_v22 = vmax.f32 %v3317_v44, %v1980_v20 }
 0x318   :  { %v1983_v30 = vmul.f32 0.01, %v3320_v41  ;;  %v2045_v28 = vmax.f32 %v3318_v11, %v1981_v12 }
 0x319   :  { %v2046_v14 = vmax.f32 %v3319_v31, %v1982_v48 }
 0x31a   :  { %v2047_v9 = vmax.f32 %v3320_v41, %v1983_v30  ;;  %v1903_v17 = vpop.f32.mrb[116].mxu0 }
 0x31b   :  { %v3321_v7 = vadd.f32 %v1903_v17, %v4192_v55  ;;  %v1905_v10 = vpop.f32.mrb[117].mxu0  ;;  %v2084_v3 = vpack.c.bf16 %v2046_v14, %v2044_v22 }
 0x31c   :  { %v3322_v8 = vadd.f32 %v1905_v10, %v4195_v62  ;;  %v1907_v19 = vpop.f32.mrb[118].mxu0  ;;  %v2085_v29 = vpack.c.bf16 %v2047_v9, %v2045_v28 }
 0x31d   :  { %v1984_v52 = vmul.f32 0.01, %v3321_v7  ;;  %v3323_v58 = vadd.f32 %v1907_v19, %v4192_v55  ;;  %v1909_v5 = vpop.f32.mrb[119].mxu0 }
 0x31e   :  { %v1985_v25 = vmul.f32 0.01, %v3322_v8  ;;  %v3324_v27 = vadd.f32 %v1909_v5, %v4195_v62  ;;  %2448 = vmatprep.mubr.bf16.mxu1 %v2085_v29 }
 0x31f   :  { %v1986_v32 = vmul.f32 0.01, %v3323_v58  ;;  %2449 = vmatmul.mubr.bf16.gmra.mrb[112].mxu1 %v2084_v3  ;;  %v2048_v33 = vmax.f32 %v3321_v7, %v1984_v52 }
 0x320   :  { %v1987_v13 = vmul.f32 0.01, %v3324_v27  ;;  %v2049_v26 = vmax.f32 %v3322_v8, %v1985_v25 }
 0x321   :  { %v2050_v34 = vmax.f32 %v3323_v58, %v1986_v32 }
 0x322   :  { %v2051_v35 = vmax.f32 %v3324_v27, %v1987_v13  ;;  %v1913_v36 = vpop.f32.mrb[120].mxu0 }
 0x323   :  { %v3325_v38 = vadd.f32 %v1913_v36, %v4192_v55  ;;  %v1915_v39 = vpop.f32.mrb[121].mxu0  ;;  %v2086_v6 = vpack.c.bf16 %v2050_v34, %v2048_v33 }
 0x324   :  { %v3326_v40 = vadd.f32 %v1915_v39, %v4195_v62  ;;  %v1917_v42 = vpop.f32.mrb[122].mxu0  ;;  %v2087_v60 = vpack.c.bf16 %v2051_v35, %v2049_v26 }
 0x325   :  { %v1988_v43 = vmul.f32 0.01, %v3325_v38  ;;  %v3327_v45 = vadd.f32 %v1917_v42, %v4192_v55  ;;  %v1919_v46 = vpop.f32.mrb[123].mxu0 }
 0x326   :  { %v1989_v47 = vmul.f32 0.01, %v3326_v40  ;;  %v3328_v49 = vadd.f32 %v1919_v46, %v4195_v62  ;;  %2458 = vmatprep.mubr.bf16.mxu1 %v2087_v60 }
 0x327   :  { %v1990_v50 = vmul.f32 0.01, %v3327_v45  ;;  %2459 = vmatmul.mubr.bf16.gmra.mrb[116].mxu1 %v2086_v6  ;;  %v2052_v54 = vmax.f32 %v3325_v38, %v1988_v43 }
 0x328   :  { %v1991_v51 = vmul.f32 0.01, %v3328_v49  ;;  %v2053_v57 = vmax.f32 %v3326_v40, %v1989_v47 }
 0x329   :  { %v2054_v56 = vmax.f32 %v3327_v45, %v1990_v50 }
 0x32a   :  { %v2055_v59 = vmax.f32 %v3328_v49, %v1991_v51  ;;  %v1923_v15 = vpop.f32.mrb[124].mxu0 }
 0x32b   :  { %v3329_v16 = vadd.f32 %v1923_v15, %v4192_v55  ;;  %v1925_v24 = vpop.f32.mrb[125].mxu0  ;;  %v2088_v18 = vpack.c.bf16 %v2054_v56, %v2052_v54 }
 0x32c   :  { %v3330_v61 = vadd.f32 %v1925_v24, %v4195_v62  ;;  %v1927_v53 = vpop.f32.mrb[126].mxu0  ;;  %v2089_v63 = vpack.c.bf16 %v2055_v59, %v2053_v57 }
 0x32d   :  { %v1992_v44 = vmul.f32 0.01, %v3329_v16  ;;  %v3331_v1 = vadd.f32 %v1927_v53, %v4192_v55  ;;  %v1929_v2 = vpop.f32.mrb[127].mxu0  ;;  %v2124_v55 = vld [vmem:[%s4392_s6] sm:$0x3] }
 0x32e   :  { %v1993_v11 = vmul.f32 0.01, %v3330_v61  ;;  %v3332_v37 = vadd.f32 %v1929_v2, %v4195_v62  ;;  %2468 = vmatprep.mubr.bf16.mxu1 %v2089_v63  ;;  %v4265_v22 = vrot.slane %v2124_v55, %v3944_v21  ;;  %v4268_v62 = vrot.slane %v2124_v55, %v3952_v23 }
 0x32f   :  { %v1994_v0 = vmul.f32 0.01, %v3331_v1  ;;  %2469 = vmatmul.mubr.bf16.gmra.mrb[120].mxu1 %v2088_v18  ;;  %v2056_v31 = vmax.f32 %v3329_v16, %v1992_v44 }
 0x330   :  { %v1995_v20 = vmul.f32 0.01, %v3332_v37  ;;  %v2057_v12 = vmax.f32 %v3330_v61, %v1993_v11 }
 0x331   :  { %v2058_v4 = vmax.f32 %v3331_v1, %v1994_v0 }
 0x332   :  { %v2059_v41 = vmax.f32 %v3332_v37, %v1995_v20 }
 0x333   :  { %v2090_v48 = vpack.c.bf16 %v2058_v4, %v2056_v31 }
 0x334   :  { %v2091_v30 = vpack.c.bf16 %v2059_v41, %v2057_v12 }
 0x336   :  { %2478 = vmatprep.mubr.bf16.mxu1 %v2091_v30 }
 0x337   :  { %2479 = vmatmul.mubr.bf16.gmra.mrb[124].mxu1 %v2090_v48 }
 0x392   :  { %v2330_v14 = vpop.f32.mrb[64].mxu1 }
 0x393   :  { %v2331_v28 = vadd.f32 %v2330_v14, %v4265_v22  ;;  %v2332_v9 = vpop.f32.mrb[65].mxu1 }
 0x394   :  { %v2333_v17 = vadd.f32 %v2332_v9, %v4268_v62  ;;  %v2334_v7 = vpop.f32.mrb[66].mxu1 }
 0x395   :  { %v2489_v10 = vmul.f32 0.01, %v2331_v28  ;;  %v2335_v3 = vadd.f32 %v2334_v7, %v4265_v22  ;;  %v2336_v8 = vpop.f32.mrb[67].mxu1 }
 0x396   :  { %v2490_v19 = vmul.f32 0.01, %v2333_v17  ;;  %v2337_v29 = vadd.f32 %v2336_v8, %v4268_v62 }
 0x397   :  { %v2491_v52 = vmul.f32 0.01, %v2335_v3  ;;  %v2553_v58 = vmax.f32 %v2331_v28, %v2489_v10 }
 0x398   :  { %v2492_v21 = vmul.f32 0.01, %v2337_v29  ;;  %v2554_v23 = vmax.f32 %v2333_v17, %v2490_v19 }
 0x399   :  { %v2555_v5 = vmax.f32 %v2335_v3, %v2491_v52 }
 0x39a   :  { %v2556_v25 = vmax.f32 %v2337_v29, %v2492_v21  ;;  %v2340_v27 = vpop.f32.mrb[68].mxu1 }
 0x39b   :  { %v2617_v32 = vpack.c.bf16 %v2555_v5, %v2553_v58  ;;  %v2341_v13 = vadd.f32 %v2340_v27, %v4265_v22  ;;  %v2342_v33 = vpop.f32.mrb[69].mxu1 }
 0x39c   :  { %v2343_v34 = vadd.f32 %v2342_v33, %v4268_v62  ;;  %v2344_v26 = vpop.f32.mrb[70].mxu1  ;;  %v2618_v35 = vpack.c.bf16 %v2556_v25, %v2554_v23 }
 0x39d   :  { %v2493_v36 = vmul.f32 0.01, %v2341_v13  ;;  %v2345_v38 = vadd.f32 %v2344_v26, %v4265_v22  ;;  %v2346_v39 = vpop.f32.mrb[71].mxu1 }
 0x39e   :  { %v2494_v6 = vmul.f32 0.01, %v2343_v34  ;;  %v2347_v40 = vadd.f32 %v2346_v39, %v4268_v62  ;;  %2816 = vmatprep.mubr.bf16.mxu1 %v2618_v35 }
 0x39f   :  { %v2495_v42 = vmul.f32 0.01, %v2345_v38  ;;  %2817 = vmatmul.mubr.bf16.vlgmr.msra.gmra.mrb[128].mxu1 %v2617_v32  ;;  %v2557_v43 = vmax.f32 %v2341_v13, %v2493_v36 }
 0x3a0   :  { %v2496_v60 = vmul.f32 0.01, %v2347_v40  ;;  %v2558_v46 = vmax.f32 %v2343_v34, %v2494_v6 }
 0x3a1   :  { %v2559_v45 = vmax.f32 %v2345_v38, %v2495_v42 }
 0x3a2   :  { %v2560_v47 = vmax.f32 %v2347_v40, %v2496_v60  ;;  %v2350_v49 = vpop.f32.mrb[72].mxu1 }
 0x3a3   :  { %v2351_v50 = vadd.f32 %v2350_v49, %v4265_v22  ;;  %v2352_v51 = vpop.f32.mrb[73].mxu1  ;;  %v2619_v54 = vpack.c.bf16 %v2559_v45, %v2557_v43 }
 0x3a4   :  { %v2353_v56 = vadd.f32 %v2352_v51, %v4268_v62  ;;  %v2354_v57 = vpop.f32.mrb[74].mxu1  ;;  %v2620_v59 = vpack.c.bf16 %v2560_v47, %v2558_v46 }
 0x3a5   :  { %v2497_v15 = vmul.f32 0.01, %v2351_v50  ;;  %v2355_v16 = vadd.f32 %v2354_v57, %v4265_v22  ;;  %v2356_v24 = vpop.f32.mrb[75].mxu1 }
 0x3a6   :  { %v2498_v18 = vmul.f32 0.01, %v2353_v56  ;;  %v2357_v61 = vadd.f32 %v2356_v24, %v4268_v62  ;;  %2824 = vmatprep.mubr.bf16.mxu1 %v2620_v59 }
 0x3a7   :  { %v2499_v53 = vmul.f32 0.01, %v2355_v16  ;;  %2825 = vmatmul.mubr.bf16.gmra.mrb[132].mxu1 %v2619_v54  ;;  %v2561_v44 = vmax.f32 %v2351_v50, %v2497_v15 }
 0x3a8   :  { %v2500_v63 = vmul.f32 0.01, %v2357_v61  ;;  %v2562_v2 = vmax.f32 %v2353_v56, %v2498_v18 }
 0x3a9   :  { %v2563_v1 = vmax.f32 %v2355_v16, %v2499_v53 }
 0x3aa   :  { %v2564_v11 = vmax.f32 %v2357_v61, %v2500_v63  ;;  %v2360_v37 = vpop.f32.mrb[76].mxu1 }
 0x3ab   :  { %v2361_v0 = vadd.f32 %v2360_v37, %v4265_v22  ;;  %v2362_v20 = vpop.f32.mrb[77].mxu1  ;;  %v2621_v31 = vpack.c.bf16 %v2563_v1, %v2561_v44 }
 0x3ac   :  { %v2363_v4 = vadd.f32 %v2362_v20, %v4268_v62  ;;  %v2364_v12 = vpop.f32.mrb[78].mxu1  ;;  %v2622_v41 = vpack.c.bf16 %v2564_v11, %v2562_v2 }
 0x3ad   :  { %v2501_v48 = vmul.f32 0.01, %v2361_v0  ;;  %v2365_v30 = vadd.f32 %v2364_v12, %v4265_v22  ;;  %v2366_v55 = vpop.f32.mrb[79].mxu1 }
 0x3ae   :  { %v2502_v14 = vmul.f32 0.01, %v2363_v4  ;;  %v2367_v28 = vadd.f32 %v2366_v55, %v4268_v62  ;;  %2832 = vmatprep.mubr.bf16.mxu1 %v2622_v41 }
 0x3af   :  { %v2503_v9 = vmul.f32 0.01, %v2365_v30  ;;  %2833 = vmatmul.mubr.bf16.gmra.mrb[136].mxu1 %v2621_v31  ;;  %v2565_v7 = vmax.f32 %v2361_v0, %v2501_v48 }
 0x3b0   :  { %v2504_v17 = vmul.f32 0.01, %v2367_v28  ;;  %v2566_v3 = vmax.f32 %v2363_v4, %v2502_v14 }
 0x3b1   :  { %v2567_v10 = vmax.f32 %v2365_v30, %v2503_v9 }
 0x3b2   :  { %v2568_v8 = vmax.f32 %v2367_v28, %v2504_v17  ;;  %v2370_v19 = vpop.f32.mrb[80].mxu1 }
 0x3b3   :  { %v2371_v29 = vadd.f32 %v2370_v19, %v4265_v22  ;;  %v2372_v52 = vpop.f32.mrb[81].mxu1  ;;  %v2623_v21 = vpack.c.bf16 %v2567_v10, %v2565_v7 }
 0x3b4   :  { %v2373_v58 = vadd.f32 %v2372_v52, %v4268_v62  ;;  %v2374_v5 = vpop.f32.mrb[82].mxu1  ;;  %v2624_v23 = vpack.c.bf16 %v2568_v8, %v2566_v3 }
 0x3b5   :  { %v2505_v25 = vmul.f32 0.01, %v2371_v29  ;;  %v2375_v27 = vadd.f32 %v2374_v5, %v4265_v22  ;;  %v2376_v32 = vpop.f32.mrb[83].mxu1 }
 0x3b6   :  { %v2506_v13 = vmul.f32 0.01, %v2373_v58  ;;  %v2377_v33 = vadd.f32 %v2376_v32, %v4268_v62  ;;  %2840 = vmatprep.mubr.bf16.mxu1 %v2624_v23 }
 0x3b7   :  { %v2507_v34 = vmul.f32 0.01, %v2375_v27  ;;  %2841 = vmatmul.mubr.bf16.gmra.mrb[140].mxu1 %v2623_v21  ;;  %v2569_v35 = vmax.f32 %v2371_v29, %v2505_v25 }
 0x3b8   :  { %v2508_v26 = vmul.f32 0.01, %v2377_v33  ;;  %v2570_v38 = vmax.f32 %v2373_v58, %v2506_v13 }
 0x3b9   :  { %v2571_v36 = vmax.f32 %v2375_v27, %v2507_v34 }
 0x3ba   :  { %v2572_v39 = vmax.f32 %v2377_v33, %v2508_v26  ;;  %v2380_v6 = vpop.f32.mrb[84].mxu1 }
 0x3bb   :  { %v2381_v40 = vadd.f32 %v2380_v6, %v4265_v22  ;;  %v2382_v42 = vpop.f32.mrb[85].mxu1  ;;  %v2625_v60 = vpack.c.bf16 %v2571_v36, %v2569_v35 }
 0x3bc   :  { %v2383_v43 = vadd.f32 %v2382_v42, %v4268_v62  ;;  %v2384_v45 = vpop.f32.mrb[86].mxu1  ;;  %v2626_v46 = vpack.c.bf16 %v2572_v39, %v2570_v38 }
 0x3bd   :  { %v2509_v47 = vmul.f32 0.01, %v2381_v40  ;;  %v2385_v49 = vadd.f32 %v2384_v45, %v4265_v22  ;;  %v2386_v50 = vpop.f32.mrb[87].mxu1 }
 0x3be   :  { %v2510_v51 = vmul.f32 0.01, %v2383_v43  ;;  %v2387_v54 = vadd.f32 %v2386_v50, %v4268_v62  ;;  %2848 = vmatprep.mubr.bf16.mxu1 %v2626_v46 }
 0x3bf   :  { %v2511_v56 = vmul.f32 0.01, %v2385_v49  ;;  %2849 = vmatmul.mubr.bf16.gmra.mrb[144].mxu1 %v2625_v60  ;;  %v2573_v59 = vmax.f32 %v2381_v40, %v2509_v47 }
 0x3c0   :  { %v2512_v57 = vmul.f32 0.01, %v2387_v54  ;;  %v2574_v16 = vmax.f32 %v2383_v43, %v2510_v51 }
 0x3c1   :  { %v2575_v15 = vmax.f32 %v2385_v49, %v2511_v56 }
 0x3c2   :  { %v2576_v24 = vmax.f32 %v2387_v54, %v2512_v57  ;;  %v2390_v18 = vpop.f32.mrb[88].mxu1 }
 0x3c3   :  { %v2391_v61 = vadd.f32 %v2390_v18, %v4265_v22  ;;  %v2392_v53 = vpop.f32.mrb[89].mxu1  ;;  %v2627_v63 = vpack.c.bf16 %v2575_v15, %v2573_v59 }
 0x3c4   :  { %v2393_v44 = vadd.f32 %v2392_v53, %v4268_v62  ;;  %v2394_v1 = vpop.f32.mrb[90].mxu1  ;;  %v2628_v2 = vpack.c.bf16 %v2576_v24, %v2574_v16 }
 0x3c5   :  { %v2513_v11 = vmul.f32 0.01, %v2391_v61  ;;  %v2395_v37 = vadd.f32 %v2394_v1, %v4265_v22  ;;  %v2396_v0 = vpop.f32.mrb[91].mxu1 }
 0x3c6   :  { %v2514_v20 = vmul.f32 0.01, %v2393_v44  ;;  %v2397_v31 = vadd.f32 %v2396_v0, %v4268_v62  ;;  %2856 = vmatprep.mubr.bf16.mxu1 %v2628_v2 }
 0x3c7   :  { %v2515_v4 = vmul.f32 0.01, %v2395_v37  ;;  %2857 = vmatmul.mubr.bf16.gmra.mrb[148].mxu1 %v2627_v63  ;;  %v2577_v41 = vmax.f32 %v2391_v61, %v2513_v11 }
 0x3c8   :  { %v2516_v12 = vmul.f32 0.01, %v2397_v31  ;;  %v2578_v30 = vmax.f32 %v2393_v44, %v2514_v20 }
 0x3c9   :  { %v2579_v48 = vmax.f32 %v2395_v37, %v2515_v4 }
 0x3ca   :  { %v2580_v55 = vmax.f32 %v2397_v31, %v2516_v12  ;;  %v2400_v14 = vpop.f32.mrb[92].mxu1 }
 0x3cb   :  { %v2401_v28 = vadd.f32 %v2400_v14, %v4265_v22  ;;  %v2402_v9 = vpop.f32.mrb[93].mxu1  ;;  %v2629_v17 = vpack.c.bf16 %v2579_v48, %v2577_v41 }
 0x3cc   :  { %v2403_v7 = vadd.f32 %v2402_v9, %v4268_v62  ;;  %v2404_v10 = vpop.f32.mrb[94].mxu1  ;;  %v2630_v3 = vpack.c.bf16 %v2580_v55, %v2578_v30 }
 0x3cd   :  { %v2517_v8 = vmul.f32 0.01, %v2401_v28  ;;  %v2405_v19 = vadd.f32 %v2404_v10, %v4265_v22  ;;  %v2406_v29 = vpop.f32.mrb[95].mxu1 }
 0x3ce   :  { %v2518_v52 = vmul.f32 0.01, %v2403_v7  ;;  %v2407_v21 = vadd.f32 %v2406_v29, %v4268_v62  ;;  %2864 = vmatprep.mubr.bf16.mxu1 %v2630_v3 }
 0x3cf   :  { %v2519_v58 = vmul.f32 0.01, %v2405_v19  ;;  %2865 = vmatmul.mubr.bf16.gmra.mrb[152].mxu1 %v2629_v17  ;;  %v2581_v23 = vmax.f32 %v2401_v28, %v2517_v8 }
 0x3d0   :  { %v2520_v5 = vmul.f32 0.01, %v2407_v21  ;;  %v2582_v27 = vmax.f32 %v2403_v7, %v2518_v52 }
 0x3d1   :  { %v2583_v25 = vmax.f32 %v2405_v19, %v2519_v58 }
 0x3d2   :  { %v2584_v32 = vmax.f32 %v2407_v21, %v2520_v5  ;;  %v2410_v13 = vpop.f32.mrb[96].mxu1 }
 0x3d3   :  { %v2411_v33 = vadd.f32 %v2410_v13, %v4265_v22  ;;  %v2412_v34 = vpop.f32.mrb[97].mxu1  ;;  %v2631_v26 = vpack.c.bf16 %v2583_v25, %v2581_v23 }
 0x3d4   :  { %v2413_v35 = vadd.f32 %v2412_v34, %v4268_v62  ;;  %v2414_v36 = vpop.f32.mrb[98].mxu1  ;;  %v2632_v38 = vpack.c.bf16 %v2584_v32, %v2582_v27 }
 0x3d5   :  { %v2521_v39 = vmul.f32 0.01, %v2411_v33  ;;  %v2415_v6 = vadd.f32 %v2414_v36, %v4265_v22  ;;  %v2416_v40 = vpop.f32.mrb[99].mxu1 }
 0x3d6   :  { %v2522_v42 = vmul.f32 0.01, %v2413_v35  ;;  %v2417_v60 = vadd.f32 %v2416_v40, %v4268_v62  ;;  %2872 = vmatprep.mubr.bf16.mxu1 %v2632_v38 }
 0x3d7   :  { %v2523_v43 = vmul.f32 0.01, %v2415_v6  ;;  %2873 = vmatmul.mubr.bf16.gmra.mrb[156].mxu1 %v2631_v26  ;;  %v2585_v46 = vmax.f32 %v2411_v33, %v2521_v39 }
 0x3d8   :  { %v2524_v45 = vmul.f32 0.01, %v2417_v60  ;;  %v2586_v49 = vmax.f32 %v2413_v35, %v2522_v42 }
 0x3d9   :  { %v2587_v47 = vmax.f32 %v2415_v6, %v2523_v43 }
 0x3da   :  { %v2588_v50 = vmax.f32 %v2417_v60, %v2524_v45  ;;  %v2420_v51 = vpop.f32.mrb[100].mxu1 }
 0x3db   :  { %v2421_v54 = vadd.f32 %v2420_v51, %v4265_v22  ;;  %v2422_v56 = vpop.f32.mrb[101].mxu1  ;;  %v2633_v57 = vpack.c.bf16 %v2587_v47, %v2585_v46 }
 0x3dc   :  { %v2423_v59 = vadd.f32 %v2422_v56, %v4268_v62  ;;  %v2424_v15 = vpop.f32.mrb[102].mxu1  ;;  %v2634_v16 = vpack.c.bf16 %v2588_v50, %v2586_v49 }
 0x3dd   :  { %v2525_v24 = vmul.f32 0.01, %v2421_v54  ;;  %v2425_v18 = vadd.f32 %v2424_v15, %v4265_v22  ;;  %v2426_v61 = vpop.f32.mrb[103].mxu1 }
 0x3de   :  { %v2526_v53 = vmul.f32 0.01, %v2423_v59  ;;  %v2427_v63 = vadd.f32 %v2426_v61, %v4268_v62  ;;  %2880 = vmatprep.mubr.bf16.mxu1 %v2634_v16 }
 0x3df   :  { %v2527_v44 = vmul.f32 0.01, %v2425_v18  ;;  %2881 = vmatmul.mubr.bf16.gmra.mrb[160].mxu1 %v2633_v57  ;;  %v2589_v2 = vmax.f32 %v2421_v54, %v2525_v24 }
 0x3e0   :  { %v2528_v1 = vmul.f32 0.01, %v2427_v63  ;;  %v2590_v37 = vmax.f32 %v2423_v59, %v2526_v53 }
 0x3e1   :  { %v2591_v11 = vmax.f32 %v2425_v18, %v2527_v44 }
 0x3e2   :  { %v2592_v0 = vmax.f32 %v2427_v63, %v2528_v1  ;;  %v2430_v20 = vpop.f32.mrb[104].mxu1 }
 0x3e3   :  { %v2431_v31 = vadd.f32 %v2430_v20, %v4265_v22  ;;  %v2432_v4 = vpop.f32.mrb[105].mxu1  ;;  %v2635_v12 = vpack.c.bf16 %v2591_v11, %v2589_v2 }
 0x3e4   :  { %v2433_v41 = vadd.f32 %v2432_v4, %v4268_v62  ;;  %v2434_v48 = vpop.f32.mrb[106].mxu1  ;;  %v2636_v30 = vpack.c.bf16 %v2592_v0, %v2590_v37 }
 0x3e5   :  { %v2529_v55 = vmul.f32 0.01, %v2431_v31  ;;  %v2435_v14 = vadd.f32 %v2434_v48, %v4265_v22  ;;  %v2436_v28 = vpop.f32.mrb[107].mxu1 }
 0x3e6   :  { %v2530_v9 = vmul.f32 0.01, %v2433_v41  ;;  %v2437_v17 = vadd.f32 %v2436_v28, %v4268_v62  ;;  %2888 = vmatprep.mubr.bf16.mxu1 %v2636_v30 }
 0x3e7   :  { %v2531_v7 = vmul.f32 0.01, %v2435_v14  ;;  %2889 = vmatmul.mubr.bf16.gmra.mrb[164].mxu1 %v2635_v12  ;;  %v2593_v3 = vmax.f32 %v2431_v31, %v2529_v55 }
 0x3e8   :  { %v2532_v10 = vmul.f32 0.01, %v2437_v17  ;;  %v2594_v19 = vmax.f32 %v2433_v41, %v2530_v9 }
 0x3e9   :  { %v2595_v8 = vmax.f32 %v2435_v14, %v2531_v7 }
 0x3ea   :  { %v2596_v29 = vmax.f32 %v2437_v17, %v2532_v10  ;;  %v2440_v52 = vpop.f32.mrb[108].mxu1 }
 0x3eb   :  { %v2441_v21 = vadd.f32 %v2440_v52, %v4265_v22  ;;  %v2442_v58 = vpop.f32.mrb[109].mxu1  ;;  %v2637_v5 = vpack.c.bf16 %v2595_v8, %v2593_v3 }
 0x3ec   :  { %v2443_v23 = vadd.f32 %v2442_v58, %v4268_v62  ;;  %v2444_v25 = vpop.f32.mrb[110].mxu1  ;;  %v2638_v27 = vpack.c.bf16 %v2596_v29, %v2594_v19 }
 0x3ed   :  { %v2533_v32 = vmul.f32 0.01, %v2441_v21  ;;  %v2445_v13 = vadd.f32 %v2444_v25, %v4265_v22  ;;  %v2446_v33 = vpop.f32.mrb[111].mxu1 }
 0x3ee   :  { %v2534_v34 = vmul.f32 0.01, %v2443_v23  ;;  %v2447_v26 = vadd.f32 %v2446_v33, %v4268_v62  ;;  %2896 = vmatprep.mubr.bf16.mxu1 %v2638_v27 }
 0x3ef   :  { %v2535_v35 = vmul.f32 0.01, %v2445_v13  ;;  %2897 = vmatmul.mubr.bf16.gmra.mrb[168].mxu1 %v2637_v5  ;;  %v2597_v38 = vmax.f32 %v2441_v21, %v2533_v32 }
 0x3f0   :  { %v2536_v36 = vmul.f32 0.01, %v2447_v26  ;;  %v2598_v6 = vmax.f32 %v2443_v23, %v2534_v34 }
 0x3f1   :  { %v2599_v39 = vmax.f32 %v2445_v13, %v2535_v35 }
 0x3f2   :  { %v2600_v40 = vmax.f32 %v2447_v26, %v2536_v36  ;;  %v2450_v42 = vpop.f32.mrb[112].mxu1 }
 0x3f3   :  { %v2451_v60 = vadd.f32 %v2450_v42, %v4265_v22  ;;  %v2452_v43 = vpop.f32.mrb[113].mxu1  ;;  %v2639_v45 = vpack.c.bf16 %v2599_v39, %v2597_v38 }
 0x3f4   :  { %v2453_v46 = vadd.f32 %v2452_v43, %v4268_v62  ;;  %v2454_v47 = vpop.f32.mrb[114].mxu1  ;;  %v2640_v49 = vpack.c.bf16 %v2600_v40, %v2598_v6 }
 0x3f5   :  { %v2537_v50 = vmul.f32 0.01, %v2451_v60  ;;  %v2455_v51 = vadd.f32 %v2454_v47, %v4265_v22  ;;  %v2456_v54 = vpop.f32.mrb[115].mxu1 }
 0x3f6   :  { %v2538_v56 = vmul.f32 0.01, %v2453_v46  ;;  %v2457_v57 = vadd.f32 %v2456_v54, %v4268_v62  ;;  %2904 = vmatprep.mubr.bf16.mxu1 %v2640_v49 }
 0x3f7   :  { %v2539_v59 = vmul.f32 0.01, %v2455_v51  ;;  %2905 = vmatmul.mubr.bf16.gmra.mrb[172].mxu1 %v2639_v45  ;;  %v2601_v16 = vmax.f32 %v2451_v60, %v2537_v50 }
 0x3f8   :  { %v2540_v15 = vmul.f32 0.01, %v2457_v57  ;;  %v2602_v18 = vmax.f32 %v2453_v46, %v2538_v56 }
 0x3f9   :  { %v2603_v24 = vmax.f32 %v2455_v51, %v2539_v59 }
 0x3fa   :  { %v2604_v61 = vmax.f32 %v2457_v57, %v2540_v15  ;;  %v2460_v53 = vpop.f32.mrb[116].mxu1 }
 0x3fb   :  { %v2461_v63 = vadd.f32 %v2460_v53, %v4265_v22  ;;  %v2462_v44 = vpop.f32.mrb[117].mxu1  ;;  %v2641_v1 = vpack.c.bf16 %v2603_v24, %v2601_v16 }
 0x3fc   :  { %v2463_v2 = vadd.f32 %v2462_v44, %v4268_v62  ;;  %v2464_v11 = vpop.f32.mrb[118].mxu1  ;;  %v2642_v37 = vpack.c.bf16 %v2604_v61, %v2602_v18 }
 0x3fd   :  { %v2541_v0 = vmul.f32 0.01, %v2461_v63  ;;  %v2465_v20 = vadd.f32 %v2464_v11, %v4265_v22  ;;  %v2466_v31 = vpop.f32.mrb[119].mxu1 }
 0x3fe   :  { %v2542_v4 = vmul.f32 0.01, %v2463_v2  ;;  %v2467_v12 = vadd.f32 %v2466_v31, %v4268_v62  ;;  %2912 = vmatprep.mubr.bf16.mxu1 %v2642_v37 }
 0x3ff   :  { %v2543_v41 = vmul.f32 0.01, %v2465_v20  ;;  %2913 = vmatmul.mubr.bf16.gmra.mrb[176].mxu1 %v2641_v1  ;;  %v2605_v30 = vmax.f32 %v2461_v63, %v2541_v0 }
 0x400   :  { %v2544_v48 = vmul.f32 0.01, %v2467_v12  ;;  %v2606_v14 = vmax.f32 %v2463_v2, %v2542_v4 }
 0x401   :  { %v2607_v55 = vmax.f32 %v2465_v20, %v2543_v41 }
 0x402   :  { %v2608_v28 = vmax.f32 %v2467_v12, %v2544_v48  ;;  %v2470_v9 = vpop.f32.mrb[120].mxu1 }
 0x403   :  { %v2471_v17 = vadd.f32 %v2470_v9, %v4265_v22  ;;  %v2472_v7 = vpop.f32.mrb[121].mxu1  ;;  %v2643_v10 = vpack.c.bf16 %v2607_v55, %v2605_v30 }
 0x404   :  { %v2473_v3 = vadd.f32 %v2472_v7, %v4268_v62  ;;  %v2474_v8 = vpop.f32.mrb[122].mxu1  ;;  %v2644_v19 = vpack.c.bf16 %v2608_v28, %v2606_v14 }
 0x405   :  { %v2545_v29 = vmul.f32 0.01, %v2471_v17  ;;  %v2475_v52 = vadd.f32 %v2474_v8, %v4265_v22  ;;  %v2476_v21 = vpop.f32.mrb[123].mxu1 }
 0x406   :  { %v2546_v58 = vmul.f32 0.01, %v2473_v3  ;;  %v2477_v5 = vadd.f32 %v2476_v21, %v4268_v62  ;;  %2920 = vmatprep.mubr.bf16.mxu1 %v2644_v19 }
 0x407   :  { %v2547_v23 = vmul.f32 0.01, %v2475_v52  ;;  %2921 = vmatmul.mubr.bf16.gmra.mrb[180].mxu1 %v2643_v10  ;;  %v2609_v27 = vmax.f32 %v2471_v17, %v2545_v29 }
 0x408   :  { %v2548_v25 = vmul.f32 0.01, %v2477_v5  ;;  %v2610_v13 = vmax.f32 %v2473_v3, %v2546_v58 }
 0x409   :  { %v2611_v32 = vmax.f32 %v2475_v52, %v2547_v23 }
 0x40a   :  { %v2612_v33 = vmax.f32 %v2477_v5, %v2548_v25  ;;  %v2480_v34 = vpop.f32.mrb[124].mxu1 }
 0x40b   :  { %v2481_v26 = vadd.f32 %v2480_v34, %v4265_v22  ;;  %v2482_v35 = vpop.f32.mrb[125].mxu1  ;;  %v2645_v36 = vpack.c.bf16 %v2611_v32, %v2609_v27 }
 0x40c   :  { %v2483_v38 = vadd.f32 %v2482_v35, %v4268_v62  ;;  %v2484_v39 = vpop.f32.mrb[126].mxu1  ;;  %v2646_v6 = vpack.c.bf16 %v2612_v33, %v2610_v13 }
 0x40d   :  { %v2549_v40 = vmul.f32 0.01, %v2481_v26  ;;  %v2485_v42 = vadd.f32 %v2484_v39, %v4265_v22  ;;  %v2486_v60 = vpop.f32.mrb[127].mxu1  ;;  %v4337_v22 = vld [vmem:[%s4394_s8] ss:$0 sm:$0xff] }
 0x40e   :  { %v2550_v43 = vmul.f32 0.01, %v2483_v38  ;;  %v2487_v45 = vadd.f32 %v2486_v60, %v4268_v62  ;;  %2928 = vmatprep.mubr.bf16.mxu1 %v2646_v6 }
 0x40f   :  { %v2551_v46 = vmul.f32 0.01, %v2485_v42  ;;  %2929 = vmatmul.mubr.bf16.gmra.mrb[184].mxu1 %v2645_v36  ;;  %v2613_v49 = vmax.f32 %v2481_v26, %v2549_v40 }
 0x410   :  { %v2552_v47 = vmul.f32 0.01, %v2487_v45  ;;  %v2614_v51 = vmax.f32 %v2483_v38, %v2550_v43 }
 0x411   :  { %v2615_v50 = vmax.f32 %v2485_v42, %v2551_v46 }
 0x412   :  { %v2616_v54 = vmax.f32 %v2487_v45, %v2552_v47 }
 0x413   :  { %v2647_v56 = vpack.c.bf16 %v2615_v50, %v2613_v49 }
 0x414   :  { %v2648_v57 = vpack.c.bf16 %v2616_v54, %v2614_v51 }
 0x416   :  { %2936 = vmatprep.mubr.bf16.mxu1 %v2648_v57 }
 0x417   :  { %2937 = vmatmul.mubr.bf16.gmra.mrb[188].mxu1 %v2647_v56 }
 0x472   :  { %v3173_v59 = vpop.f32.mrb[128].mxu1 }
 0x473   :  { %v3174_v15 = vpop.f32.mrb[129].mxu1 }
 0x474   :  { %v3175_v62 = vadd.f32 %v3174_v15, %v3173_v59  ;;  %v3176_v16 = vpop.f32.mrb[130].mxu1 }
 0x475   :  { %v3177_v24 = vpop.f32.mrb[131].mxu1 }
 0x476   :  { %v2819_v18 = vadd.f32 %v3175_v62, %v4337_v22  ;;  %v3178_v61 = vadd.f32 %v3177_v24, %v3176_v16 }
 0x478   :  { %2945 = vst [vmem:[#allocation11] sm:$0xff] %v2819_v18  ;;  %v2822_v53 = vadd.f32 %v3178_v61, %v4337_v22 }
 0x47a   :  { %2946 = vst [vmem:[#allocation11 + $0x8] sm:$0xff] %v2822_v53  ;;  %v3179_v63 = vpop.f32.mrb[132].mxu1 }
 0x47b   :  { %v3180_v44 = vpop.f32.mrb[133].mxu1 }
 0x47c   :  { %v3181_v1 = vadd.f32 %v3180_v44, %v3179_v63  ;;  %v3182_v2 = vpop.f32.mrb[134].mxu1 }
 0x47d   :  { %v3183_v11 = vpop.f32.mrb[135].mxu1 }
 0x47e   :  { %v2827_v37 = vadd.f32 %v3181_v1, %v4337_v22  ;;  %v3184_v0 = vadd.f32 %v3183_v11, %v3182_v2 }
 0x480   :  { %2947 = vst [vmem:[#allocation11 + $0x10] sm:$0xff] %v2827_v37  ;;  %v2830_v20 = vadd.f32 %v3184_v0, %v4337_v22 }
 0x482   :  { %2948 = vst [vmem:[#allocation11 + $0x18] sm:$0xff] %v2830_v20  ;;  %v3185_v31 = vpop.f32.mrb[136].mxu1 }
 0x483   :  { %v3186_v4 = vpop.f32.mrb[137].mxu1 }
 0x484   :  { %v3187_v12 = vadd.f32 %v3186_v4, %v3185_v31  ;;  %v3188_v41 = vpop.f32.mrb[138].mxu1 }
 0x485   :  { %v3189_v48 = vpop.f32.mrb[139].mxu1 }
 0x486   :  { %v2835_v30 = vadd.f32 %v3187_v12, %v4337_v22  ;;  %v3190_v55 = vadd.f32 %v3189_v48, %v3188_v41 }
 0x488   :  { %2949 = vst [vmem:[#allocation11 + $0x20] sm:$0xff] %v2835_v30  ;;  %v2838_v14 = vadd.f32 %v3190_v55, %v4337_v22 }
 0x48a   :  { %2950 = vst [vmem:[#allocation11 + $0x28] sm:$0xff] %v2838_v14  ;;  %v3191_v28 = vpop.f32.mrb[140].mxu1 }
 0x48b   :  { %v3192_v9 = vpop.f32.mrb[141].mxu1 }
 0x48c   :  { %v3193_v17 = vadd.f32 %v3192_v9, %v3191_v28  ;;  %v3194_v7 = vpop.f32.mrb[142].mxu1 }
 0x48d   :  { %v3195_v10 = vpop.f32.mrb[143].mxu1 }
 0x48e   :  { %v2843_v3 = vadd.f32 %v3193_v17, %v4337_v22  ;;  %v3196_v8 = vadd.f32 %v3195_v10, %v3194_v7 }
 0x490   :  { %2951 = vst [vmem:[#allocation11 + $0x30] sm:$0xff] %v2843_v3  ;;  %v2846_v19 = vadd.f32 %v3196_v8, %v4337_v22 }
 0x492   :  { %2952 = vst [vmem:[#allocation11 + $0x38] sm:$0xff] %v2846_v19  ;;  %v3197_v29 = vpop.f32.mrb[144].mxu1 }
 0x493   :  { %v3198_v52 = vpop.f32.mrb[145].mxu1 }
 0x494   :  { %v3199_v21 = vadd.f32 %v3198_v52, %v3197_v29  ;;  %v3200_v58 = vpop.f32.mrb[146].mxu1 }
 0x495   :  { %v3201_v5 = vpop.f32.mrb[147].mxu1 }
 0x496   :  { %v2851_v23 = vadd.f32 %v3199_v21, %v4337_v22  ;;  %v3202_v25 = vadd.f32 %v3201_v5, %v3200_v58 }
 0x498   :  { %2953 = vst [vmem:[#allocation11 + $0x40] sm:$0xff] %v2851_v23  ;;  %v2854_v27 = vadd.f32 %v3202_v25, %v4337_v22 }
 0x49a   :  { %2954 = vst [vmem:[#allocation11 + $0x48] sm:$0xff] %v2854_v27  ;;  %v3203_v32 = vpop.f32.mrb[148].mxu1 }
 0x49b   :  { %v3204_v13 = vpop.f32.mrb[149].mxu1 }
 0x49c   :  { %v3205_v33 = vadd.f32 %v3204_v13, %v3203_v32  ;;  %v3206_v34 = vpop.f32.mrb[150].mxu1 }
 0x49d   :  { %v3207_v26 = vpop.f32.mrb[151].mxu1 }
 0x49e   :  { %v2859_v35 = vadd.f32 %v3205_v33, %v4337_v22  ;;  %v3208_v36 = vadd.f32 %v3207_v26, %v3206_v34 }
 0x4a0   :  { %2955 = vst [vmem:[#allocation11 + $0x50] sm:$0xff] %v2859_v35  ;;  %v2862_v38 = vadd.f32 %v3208_v36, %v4337_v22 }
 0x4a2   :  { %2956 = vst [vmem:[#allocation11 + $0x58] sm:$0xff] %v2862_v38  ;;  %v3209_v39 = vpop.f32.mrb[152].mxu1 }
 0x4a3   :  { %v3210_v6 = vpop.f32.mrb[153].mxu1 }
 0x4a4   :  { %v3211_v40 = vadd.f32 %v3210_v6, %v3209_v39  ;;  %v3212_v42 = vpop.f32.mrb[154].mxu1 }
 0x4a5   :  { %v3213_v60 = vpop.f32.mrb[155].mxu1 }
 0x4a6   :  { %v2867_v43 = vadd.f32 %v3211_v40, %v4337_v22  ;;  %v3214_v45 = vadd.f32 %v3213_v60, %v3212_v42 }
 0x4a8   :  { %2957 = vst [vmem:[#allocation11 + $0x60] sm:$0xff] %v2867_v43  ;;  %v2870_v46 = vadd.f32 %v3214_v45, %v4337_v22 }
 0x4aa   :  { %2958 = vst [vmem:[#allocation11 + $0x68] sm:$0xff] %v2870_v46  ;;  %v3215_v47 = vpop.f32.mrb[156].mxu1 }
 0x4ab   :  { %v3216_v49 = vpop.f32.mrb[157].mxu1 }
 0x4ac   :  { %v3217_v50 = vadd.f32 %v3216_v49, %v3215_v47  ;;  %v3218_v51 = vpop.f32.mrb[158].mxu1 }
 0x4ad   :  { %v3219_v54 = vpop.f32.mrb[159].mxu1 }
 0x4ae   :  { %v2875_v56 = vadd.f32 %v3217_v50, %v4337_v22  ;;  %v3220_v57 = vadd.f32 %v3219_v54, %v3218_v51 }
 0x4b0   :  { %2959 = vst [vmem:[#allocation11 + $0x70] sm:$0xff] %v2875_v56  ;;  %v2878_v59 = vadd.f32 %v3220_v57, %v4337_v22 }
 0x4b2   :  { %2960 = vst [vmem:[#allocation11 + $0x78] sm:$0xff] %v2878_v59  ;;  %v3221_v15 = vpop.f32.mrb[160].mxu1 }
 0x4b3   :  { %v3222_v62 = vpop.f32.mrb[161].mxu1 }
 0x4b4   :  { %v3223_v16 = vadd.f32 %v3222_v62, %v3221_v15  ;;  %v3224_v24 = vpop.f32.mrb[162].mxu1 }
 0x4b5   :  { %v3225_v18 = vpop.f32.mrb[163].mxu1 }
 0x4b6   :  { %v2883_v61 = vadd.f32 %v3223_v16, %v4337_v22  ;;  %v3226_v53 = vadd.f32 %v3225_v18, %v3224_v24 }
 0x4b8   :  { %2961 = vst [vmem:[#allocation11 + $0x80] sm:$0xff] %v2883_v61  ;;  %v2886_v63 = vadd.f32 %v3226_v53, %v4337_v22 }
 0x4ba   :  { %2962 = vst [vmem:[#allocation11 + $0x88] sm:$0xff] %v2886_v63  ;;  %v3227_v44 = vpop.f32.mrb[164].mxu1 }
 0x4bb   :  { %v3228_v1 = vpop.f32.mrb[165].mxu1 }
 0x4bc   :  { %v3229_v2 = vadd.f32 %v3228_v1, %v3227_v44  ;;  %v3230_v11 = vpop.f32.mrb[166].mxu1 }
 0x4bd   :  { %v3231_v37 = vpop.f32.mrb[167].mxu1 }
 0x4be   :  { %v2891_v0 = vadd.f32 %v3229_v2, %v4337_v22  ;;  %v3232_v20 = vadd.f32 %v3231_v37, %v3230_v11 }
 0x4c0   :  { %2963 = vst [vmem:[#allocation11 + $0x90] sm:$0xff] %v2891_v0  ;;  %v2894_v31 = vadd.f32 %v3232_v20, %v4337_v22 }
 0x4c2   :  { %2964 = vst [vmem:[#allocation11 + $0x98] sm:$0xff] %v2894_v31  ;;  %v3233_v4 = vpop.f32.mrb[168].mxu1 }
 0x4c3   :  { %v3234_v12 = vpop.f32.mrb[169].mxu1 }
 0x4c4   :  { %v3235_v41 = vadd.f32 %v3234_v12, %v3233_v4  ;;  %v3236_v48 = vpop.f32.mrb[170].mxu1 }
 0x4c5   :  { %v3237_v30 = vpop.f32.mrb[171].mxu1 }
 0x4c6   :  { %v2899_v55 = vadd.f32 %v3235_v41, %v4337_v22  ;;  %v3238_v14 = vadd.f32 %v3237_v30, %v3236_v48 }
 0x4c8   :  { %2965 = vst [vmem:[#allocation11 + $0xa0] sm:$0xff] %v2899_v55  ;;  %v2902_v28 = vadd.f32 %v3238_v14, %v4337_v22 }
 0x4ca   :  { %2966 = vst [vmem:[#allocation11 + $0xa8] sm:$0xff] %v2902_v28  ;;  %v3239_v9 = vpop.f32.mrb[172].mxu1 }
 0x4cb   :  { %v3240_v17 = vpop.f32.mrb[173].mxu1 }
 0x4cc   :  { %v3241_v7 = vadd.f32 %v3240_v17, %v3239_v9  ;;  %v3242_v10 = vpop.f32.mrb[174].mxu1 }
 0x4cd   :  { %v3243_v3 = vpop.f32.mrb[175].mxu1 }
 0x4ce   :  { %v2907_v8 = vadd.f32 %v3241_v7, %v4337_v22  ;;  %v3244_v19 = vadd.f32 %v3243_v3, %v3242_v10 }
 0x4d0   :  { %2967 = vst [vmem:[#allocation11 + $0xb0] sm:$0xff] %v2907_v8  ;;  %v2910_v29 = vadd.f32 %v3244_v19, %v4337_v22 }
 0x4d2   :  { %2968 = vst [vmem:[#allocation11 + $0xb8] sm:$0xff] %v2910_v29  ;;  %v3245_v52 = vpop.f32.mrb[176].mxu1 }
 0x4d3   :  { %v3246_v21 = vpop.f32.mrb[177].mxu1 }
 0x4d4   :  { %v3247_v58 = vadd.f32 %v3246_v21, %v3245_v52  ;;  %v3248_v5 = vpop.f32.mrb[178].mxu1 }
 0x4d5   :  { %v3249_v23 = vpop.f32.mrb[179].mxu1 }
 0x4d6   :  { %v2915_v25 = vadd.f32 %v3247_v58, %v4337_v22  ;;  %v3250_v27 = vadd.f32 %v3249_v23, %v3248_v5 }
 0x4d8   :  { %2969 = vst [vmem:[#allocation11 + $0xc0] sm:$0xff] %v2915_v25  ;;  %v2918_v32 = vadd.f32 %v3250_v27, %v4337_v22 }
 0x4da   :  { %2970 = vst [vmem:[#allocation11 + $0xc8] sm:$0xff] %v2918_v32  ;;  %v3251_v13 = vpop.f32.mrb[180].mxu1 }
 0x4db   :  { %v3252_v33 = vpop.f32.mrb[181].mxu1 }
 0x4dc   :  { %v3253_v34 = vadd.f32 %v3252_v33, %v3251_v13  ;;  %v3254_v26 = vpop.f32.mrb[182].mxu1 }
 0x4dd   :  { %v3255_v35 = vpop.f32.mrb[183].mxu1 }
 0x4de   :  { %v2923_v36 = vadd.f32 %v3253_v34, %v4337_v22  ;;  %v3256_v38 = vadd.f32 %v3255_v35, %v3254_v26 }
 0x4e0   :  { %2971 = vst [vmem:[#allocation11 + $0xd0] sm:$0xff] %v2923_v36  ;;  %v2926_v39 = vadd.f32 %v3256_v38, %v4337_v22 }
 0x4e2   :  { %2972 = vst [vmem:[#allocation11 + $0xd8] sm:$0xff] %v2926_v39  ;;  %v3257_v6 = vpop.f32.mrb[184].mxu1 }
 0x4e3   :  { %v3258_v40 = vpop.f32.mrb[185].mxu1 }
 0x4e4   :  { %v3259_v42 = vadd.f32 %v3258_v40, %v3257_v6  ;;  %v3260_v60 = vpop.f32.mrb[186].mxu1 }
 0x4e5   :  { %v3261_v43 = vpop.f32.mrb[187].mxu1 }
 0x4e6   :  { %v2931_v45 = vadd.f32 %v3259_v42, %v4337_v22  ;;  %v3262_v46 = vadd.f32 %v3261_v43, %v3260_v60 }
 0x4e8   :  { %2973 = vst [vmem:[#allocation11 + $0xe0] sm:$0xff] %v2931_v45  ;;  %v2934_v47 = vadd.f32 %v3262_v46, %v4337_v22 }
 0x4ea   :  { %2974 = vst [vmem:[#allocation11 + $0xe8] sm:$0xff] %v2934_v47  ;;  %v3263_v49 = vpop.f32.mrb[188].mxu1 }
 0x4eb   :  { %v3264_v50 = vpop.f32.mrb[189].mxu1 }
 0x4ec   :  { %v3265_v51 = vadd.f32 %v3264_v50, %v3263_v49  ;;  %v3266_v54 = vpop.f32.mrb[190].mxu1 }
 0x4ed   :  { %v3267_v56 = vpop.f32.mrb[191].mxu1 }
 0x4ee   :  { %v2939_v57 = vadd.f32 %v3265_v51, %v4337_v22  ;;  %v3268_v59 = vadd.f32 %v3267_v56, %v3266_v54 }
 0x4f0   :  { %2975 = vst [vmem:[#allocation11 + $0xf0] sm:$0xff] %v2939_v57  ;;  %v2942_v15 = vadd.f32 %v3268_v59, %v4337_v22 }
 0x4f2   :  { %2976 = vst [vmem:[#allocation11 + $0xf8] sm:$0xff] %v2942_v15 }
 0x4f3   :  { %2981 = vsyncadd [#allocation4], 3968  ;;  %s3786_s8 = smov [#allocation11]  }
 0x4f4   :  { %s2982_s15 = sshll.u32 %s3786_s8, 4  ;;  %s2983_s15 = int_to_ptr.vmem [resolvable:$true] %s2982_s15 }
 0x4f5   :  { %s3744_s16 = scalar_lea.vmem %s2983_s15, 128  ;;  %s3748_s17 = scalar_lea.vmem %s2983_s15, 4096 }
 0x4f6   :  { %p3745_p12 = scmp.ne.s32.totalorder %s2983_s15, %s3744_s16  ;;  %p3749_p13 = scmp.lt.s32.totalorder %s2983_s15, %s2983_s15 }
 0x4f7   :  { %p3750_p0 = scmp.lt.s32.totalorder %s3748_s17, %s3744_s16 }
 0x4f9   :  { %p3751_p1 = por %p3750_p0, %p3749_p13 }
 0x4fb   :  { %p3752_p2 = pnand %p3751_p1, %p3745_p12 }
 0x4fd   :  { %3755 = shalt.err (!%p3752_p2)
}
 0x4fe   :  { %s3756_s20 = scalar_lea.hbm %s4395_s9, 128 }
 0x4ff   :  { %p3757_p3 = scmp.ne.s32.totalorder %s4395_s9, %s3756_s20  ;;  %p3760_p4 = scmp.lt.u32.totalorder %s3756_s20, %s4395_s9 }
 0x501   :  { %p3762_p5 = pnand %p3760_p4, %p3757_p3 }
 0x503   :  { %3765 = shalt.err (!%p3762_p5)
}
 0x504   :  { %2988 = dma.vmem_to_hbm [thread:$0]  %s2983_s15, 128, %s4395_s9, [#allocation4], %s3779_s10, %s3779_s10, %s3780_s14  }
 0x505   :  { %3772 = dma.done.wait [#allocation4], 4096  }
 0x506   :  { %3773 = vsyncadd [#allocation4], 4294963200 }
 0x507   :  { %2992 = vsyncpa [#allocation3], 1 }
 0x508   :  { %2993 = vsyncpa [#allocation6], 1 }
 0x509   :  { %2994 = vsyncpa [#allocation9], 1 }
 0x50a   :  { %2995 = vsyncpa [#allocation4], 1 }

</bundles_post_ra>
